<compile_context>
chip_gen: v7x
topology: tpu7x:2x2x1
jax: 0.10.0
libtpu: 0.0.40
codegen_flags: <defaults>
</compile_context>

<pallas_src>
import functools

import jax
import jax.numpy as jnp
from jax import lax
from jax.experimental import pallas as pl
from jax.experimental.pallas import tpu as pltpu

EPS = 1e-5          # PyTorch InstanceNorm2d default eps
NEG_SLOPE = 0.01    # PyTorch nn.LeakyReLU default negative_slope


def _round_up(x, m):
    return ((x + m - 1) // m) * m


def _instance_norm(y, gamma, beta):
    # Per-channel stats over the flattened spatial axis, biased variance
    # (PyTorch InstanceNorm2d semantics), single pass, variance clamped >= 0.
    inv_n = 1.0 / y.shape[0]
    mean = jnp.sum(y, axis=0, keepdims=True) * inv_n
    ex2 = jnp.sum(y * y, axis=0, keepdims=True) * inv_n
    var = jnp.maximum(ex2 - mean * mean, 0.0)
    return (y - mean) * lax.rsqrt(var + EPS) * gamma + beta


def _leaky_relu(v):
    return jnp.where(v >= 0, v, NEG_SLOPE * v)


def _res_stride_kernel(xph_ref, w1s_ref, w2_ref, gb_ref, out_ref, *, oh, ow):
    n_sp = oh * ow
    c_out_p = out_ref.shape[-1]
    gb = gb_ref[...]                      # (6, C) f32: g1,b1,g2,b2,gs,bs
    x = xph_ref[0]                        # (n_sp, k_pad) bf16, lane-dense

    # ---- conv1 (3x3/s2/p1) + folded 1x1/s2 shortcut: ONE matmul, N = 2*C ----
    acc = jnp.dot(x, w1s_ref[...], preferred_element_type=jnp.float32)
    h = _leaky_relu(_instance_norm(acc[:, :c_out_p], gb[0:1], gb[1:2]))   # f32
    sc = _instance_norm(acc[:, c_out_p:], gb[4:5], gb[5:6])               # f32

    # ---- conv2 (3x3/s1/p1) ----
    # Shared dw-tap matrix V (bf16): the +-1 flat shifts are XLU rotations whose
    # single wrapped row is exactly the column that can never legally feed that dw,
    # so the column mask doubles as the wraparound fix.  The dh row shift is applied
    # to the f32 matmul outputs instead of the inputs (linear in the contraction).
    col = lax.broadcasted_iota(jnp.int32, (n_sp, 1), 0) % ow
    hL = jnp.where(col == ow - 1, 0.0, h)     # source col ow-1 never feeds dw=-1
    hR = jnp.where(col == 0, 0.0, h)          # source col 0    never feeds dw=+1
    vL = pltpu.roll(hL, shift=1, axis=0)          # vL[i] = hL[i-1]
    vR = pltpu.roll(hR, shift=n_sp - 1, axis=0)   # vR[i] = hR[i+1]
    V = jnp.concatenate(
        [vL.astype(jnp.bfloat16), h.astype(jnp.bfloat16), vR.astype(jnp.bfloat16)],
        axis=-1)                              # (n_sp, 3*C) bf16, lane-aligned concat

    u0 = jnp.dot(V, w2_ref[0], preferred_element_type=jnp.float32)   # kh=0 (dh=-1)
    u1 = jnp.dot(V, w2_ref[1], preferred_element_type=jnp.float32)   # kh=1 (dh= 0)
    u2 = jnp.dot(V, w2_ref[2], preferred_element_type=jnp.float32)   # kh=2 (dh=+1)
    zrows = jnp.zeros((ow, c_out_p), jnp.float32)
    acc2 = (u1
            + jnp.concatenate([zrows, u0[:n_sp - ow]], axis=0)       # shift down by ow
            + jnp.concatenate([u2[ow:], zrows], axis=0))             # shift up by ow
    res = _instance_norm(acc2, gb[2:3], gb[3:4])

    out_ref[0] = _leaky_relu(res + sc).astype(out_ref.dtype)


def res_stride_block(x_nhwc, params, out_dtype=jnp.bfloat16):
    B, H, W, c_in = x_nhwc.shape
    assert H % 2 == 0 and W % 2 == 0, "k3/s2/p1 output size derivation assumes even H, W"
    c_out = params["w1"].shape[-1]
    oh, ow = H // 2, W // 2
    n_sp = oh * ow
    c_out_p = _round_up(max(c_out, 128), 128)     # lane-dense channel dim
    k_raw = 9 * c_in
    k_pad = _round_up(k_raw, 128)                 # lane-dense / aligned K for conv1

    # Glue (pure data movement): 9 stride-2 phase views of the zero-padded input,
    # concatenated along channels -> lane-dense bf16 LHS for conv1.
    x_pad = jnp.pad(x_nhwc, ((0, 0), (1, 1), (1, 1), (0, 0)))
    phases = [x_pad[:, kh:kh + 2 * oh:2, kw:kw + 2 * ow:2, :]
              for kh in range(3) for kw in range(3)]
    xph = jnp.concatenate(phases, axis=-1).reshape(B, n_sp, k_raw)
    xph = jnp.pad(xph, ((0, 0), (0, 0), (0, k_pad - k_raw))).astype(jnp.bfloat16)

    co_pad = c_out_p - c_out
    # W1 columns [0, C): conv1 weights; columns [C, 2C): 1x1 shortcut weights placed
    # at the centre-phase rows -> shortcut rides the same MXU matmul.
    w1 = jnp.pad(params["w1"].reshape(k_raw, c_out), ((0, k_pad - k_raw), (0, co_pad)))
    ws = jnp.zeros((k_pad, c_out_p), jnp.float32)
    ws = ws.at[4 * c_in:5 * c_in, :c_out].set(params["ws"].reshape(c_in, c_out))
    w1s = jnp.concatenate([w1, ws], axis=-1).astype(jnp.bfloat16)    # (k_pad, 2*C)

    w2 = jnp.pad(params["w2"], ((0, 0), (0, 0), (0, co_pad), (0, co_pad)))
    w2 = w2.reshape(3, 3 * c_out_p, c_out_p).astype(jnp.bfloat16)    # per-kh blocks

    def aff(v, fill):
        return jnp.pad(v, (0, co_pad), constant_values=fill)
    gb = jnp.stack([aff(params["g1"], 1.0), aff(params["b1"], 0.0),
                    aff(params["g2"], 1.0), aff(params["b2"], 0.0),
                    aff(params["gs"], 1.0), aff(params["bs"], 0.0)],
                   axis=0).astype(jnp.float32)

    kernel = functools.partial(_res_stride_kernel, oh=oh, ow=ow)

    grid_spec = pltpu.PrefetchScalarGridSpec(
        num_scalar_prefetch=0,
        grid=(B,),
        in_specs=[
            pl.BlockSpec((1, n_sp, k_pad), lambda b: (b, 0, 0)),           # xph (bf16)
            pl.BlockSpec((k_pad, 2 * c_out_p), lambda b: (0, 0)),          # W1+Ws (bf16)
            pl.BlockSpec((3, 3 * c_out_p, c_out_p), lambda b: (0, 0, 0)),  # W2 (bf16)
            pl.BlockSpec((6, c_out_p), lambda b: (0, 0)),                  # affine (f32)
        ],
        out_specs=pl.BlockSpec((1, n_sp, c_out_p), lambda b: (b, 0, 0)),
    )

    out = pl.pallas_call(
        kernel,
        out_shape=jax.ShapeDtypeStruct((B, n_sp, c_out_p), out_dtype),
        grid_spec=grid_spec,
        compiler_params=pltpu.CompilerParams(
            dimension_semantics=("parallel",),
            vmem_limit_bytes=64 * 1024 * 1024),
    )(xph, w1s, w2, gb)

    return out[:, :, :c_out].reshape(B, oh, ow, c_out)


def init_params(key, c_in, c_out):
    ks = jax.random.split(key, 9)
    return {
        "w1": 0.1 * jax.random.normal(ks[0], (3, 3, c_in, c_out), jnp.float32),
        "w2": 0.1 * jax.random.normal(ks[1], (3, 3, c_out, c_out), jnp.float32),
        "ws": 0.1 * jax.random.normal(ks[2], (1, 1, c_in, c_out), jnp.float32),
        "g1": 1.0 + 0.1 * jax.random.normal(ks[3], (c_out,), jnp.float32),
        "b1": 0.1 * jax.random.normal(ks[4], (c_out,), jnp.float32),
        "g2": 1.0 + 0.1 * jax.random.normal(ks[5], (c_out,), jnp.float32),
        "b2": 0.1 * jax.random.normal(ks[6], (c_out,), jnp.float32),
        "gs": 1.0 + 0.1 * jax.random.normal(ks[7], (c_out,), jnp.float32),
        "bs": 0.1 * jax.random.normal(ks[8], (c_out,), jnp.float32),
    }


def reference(x_nhwc, p):
    # Pure-JAX reference (mirrors the PyTorch forward, NHWC).  MXU operands are
    # rounded through bf16 exactly like the kernel so the comparison is tight;
    # remaining mismatch is f32 accumulation order, ulp-level rounding of the bf16
    # intermediate activation, and the bf16 output store.
    dn = ("NHWC", "HWIO", "NHWC")
    bf = lambda a: a.astype(jnp.bfloat16).astype(jnp.float32)

    def inorm(y, g, b):
        m = y.mean(axis=(1, 2), keepdims=True)
        v = ((y - m) ** 2).mean(axis=(1, 2), keepdims=True)
        return (y - m) * lax.rsqrt(v + EPS) * g + b

    def leaky(v):
        return jnp.where(v >= 0, v, NEG_SLOPE * v)

    x = bf(x_nhwc)
    y = lax.conv_general_dilated(x, bf(p["w1"]), (2, 2), ((1, 1), (1, 1)),
                                 dimension_numbers=dn,
                                 precision=lax.Precision.HIGHEST)
    y = leaky(inorm(y, p["g1"], p["b1"]))
    y = lax.conv_general_dilated(bf(y), bf(p["w2"]), (1, 1), ((1, 1), (1, 1)),
                                 dimension_numbers=dn,
                                 precision=lax.Precision.HIGHEST)
    y = inorm(y, p["g2"], p["b2"])
    s = lax.conv_general_dilated(x, bf(p["ws"]), (2, 2), ((0, 0), (0, 0)),
                                 dimension_numbers=dn,
                                 precision=lax.Precision.HIGHEST)
    s = inorm(s, p["gs"], p["bs"])
    return leaky(y + s)


if __name__ == "__main__":
    key = jax.random.PRNGKey(0)
    kx, kp = jax.random.split(key)

    B, C_in, C_out, H, W = 2, 4, 8, 16, 16
    x_nchw = jax.random.normal(kx, (B, C_in, H, W), jnp.float32)   # PyTorch-style input
    x_nhwc = jnp.transpose(x_nchw, (0, 2, 3, 1))                   # kernel layout
    params = init_params(kp, C_in, C_out)

    out = jax.jit(res_stride_block)(x_nhwc, params)
    out = jax.block_until_ready(out)

    ref = reference(x_nhwc, params)
    assert out.shape == (B, H // 2, W // 2, C_out)
    out_f32 = out.astype(jnp.float32)
    max_err = float(jnp.max(jnp.abs(out_f32 - ref)))
    # Tolerance covers bf16-operand matmuls (f32 accumulation), ulp-level rounding of
    # the bf16 intermediate activation, and the bf16 output store.
    assert jnp.allclose(out_f32, ref, atol=3e-2, rtol=3e-2), f"max_err={max_err}"

    print("KERNEL_OK")
</pallas_src>

<mosaic_0001>
module attributes {stable_mosaic.version = 11 : i64} {
  func.func @_res_stride_kernel(%arg0: i32, %arg1: memref<1x64x128xbf16, #tpu.memory_space<vmem>>, %arg2: memref<128x256xbf16, #tpu.memory_space<vmem>>, %arg3: memref<3x384x128xbf16, #tpu.memory_space<vmem>>, %arg4: memref<6x128xf32, #tpu.memory_space<vmem>>, %arg5: memref<1x64x128xbf16, #tpu.memory_space<vmem>>) attributes {dimension_semantics = [#tpu.dimension_semantics<parallel>], iteration_bounds = array<i64: 2>, scalar_prefetch = 0 : i64, scratch_operands = 0 : i64, tpu.core_type = #tpu.core_type<tc>, window_params = [{transform_indices = @transform_0, window_bounds = array<i64: 1, 64, 128>}, {pipeline_mode = #tpu.pipeline_mode<synchronous>, transform_indices = @transform_1, window_bounds = array<i64: 128, 256>}, {pipeline_mode = #tpu.pipeline_mode<synchronous>, transform_indices = @transform_2, window_bounds = array<i64: 3, 384, 128>}, {pipeline_mode = #tpu.pipeline_mode<synchronous>, transform_indices = @transform_3, window_bounds = array<i64: 6, 128>}, {transform_indices = @transform_4, window_bounds = array<i64: 1, 64, 128>}]} {
    %c0 = arith.constant 0 : index
    %c0_0 = arith.constant 0 : index
    %0 = vector.load %arg4[%c0, %c0_0] : memref<6x128xf32, #tpu.memory_space<vmem>>, vector<6x128xf32>
    %c0_1 = arith.constant 0 : index
    %c0_2 = arith.constant 0 : index
    %c0_3 = arith.constant 0 : index
    %1 = vector.load %arg1[%c0_1, %c0_2, %c0_3] : memref<1x64x128xbf16, #tpu.memory_space<vmem>>, vector<1x64x128xbf16>
    %2 = vector.shape_cast %1 : vector<1x64x128xbf16> to vector<64x128xbf16>
    %c0_4 = arith.constant 0 : index
    %c0_5 = arith.constant 0 : index
    %3 = vector.load %arg2[%c0_4, %c0_5] : memref<128x256xbf16, #tpu.memory_space<vmem>>, vector<128x256xbf16>
    %cst = arith.constant dense<0.000000e+00> : vector<64x256xf32>
    %4 = tpu.matmul %2, %3, %cst {dimension_numbers = #tpu.dot_dimension_numbers<[1], [0], [0], [1], [0, 0, 1, 1], [], []>} : vector<64x128xbf16>, vector<128x256xbf16>, vector<64x256xf32> -> vector<64x256xf32>
    %5 = vector.extract_strided_slice %4 {offsets = [0, 0], sizes = [64, 128], strides = [1, 1]} : vector<64x256xf32> to vector<64x128xf32>
    %6 = vector.extract_strided_slice %0 {offsets = [0, 0], sizes = [1, 128], strides = [1, 1]} : vector<6x128xf32> to vector<1x128xf32>
    %7 = vector.extract_strided_slice %0 {offsets = [1, 0], sizes = [1, 128], strides = [1, 1]} : vector<6x128xf32> to vector<1x128xf32>
    %cst_6 = arith.constant dense<0.000000e+00> : vector<128xf32>
    %8 = vector.multi_reduction <add>, %5, %cst_6 [0] : vector<64x128xf32> to vector<128xf32>
    %9 = vector.shape_cast %8 : vector<128xf32> to vector<1x128xf32>
    %cst_7 = arith.constant 1.562500e-02 : f32
    %10 = vector.broadcast %cst_7 : f32 to vector<1x128xf32>
    %11 = arith.mulf %9, %10 : vector<1x128xf32>
    %12 = arith.mulf %5, %5 : vector<64x128xf32>
    %cst_8 = arith.constant dense<0.000000e+00> : vector<128xf32>
    %13 = vector.multi_reduction <add>, %12, %cst_8 [0] : vector<64x128xf32> to vector<128xf32>
    %14 = vector.shape_cast %13 : vector<128xf32> to vector<1x128xf32>
    %cst_9 = arith.constant 1.562500e-02 : f32
    %15 = vector.broadcast %cst_9 : f32 to vector<1x128xf32>
    %16 = arith.mulf %14, %15 : vector<1x128xf32>
    %17 = arith.mulf %11, %11 : vector<1x128xf32>
    %18 = arith.subf %16, %17 : vector<1x128xf32>
    %cst_10 = arith.constant 0.000000e+00 : f32
    %19 = vector.broadcast %cst_10 : f32 to vector<1x128xf32>
    %20 = arith.maximumf %18, %19 : vector<1x128xf32>
    %21 = vector.broadcast %11 : vector<1x128xf32> to vector<64x128xf32>
    %22 = arith.subf %5, %21 : vector<64x128xf32>
    %cst_11 = arith.constant 9.99999974E-6 : f32
    %23 = vector.broadcast %cst_11 : f32 to vector<1x128xf32>
    %24 = arith.addf %20, %23 : vector<1x128xf32>
    %25 = math.rsqrt %24 : vector<1x128xf32>
    %26 = vector.broadcast %25 : vector<1x128xf32> to vector<64x128xf32>
    %27 = arith.mulf %22, %26 : vector<64x128xf32>
    %28 = vector.broadcast %6 : vector<1x128xf32> to vector<64x128xf32>
    %29 = arith.mulf %27, %28 : vector<64x128xf32>
    %30 = vector.broadcast %7 : vector<1x128xf32> to vector<64x128xf32>
    %31 = arith.addf %29, %30 : vector<64x128xf32>
    %cst_12 = arith.constant 0.000000e+00 : f32
    %32 = vector.broadcast %cst_12 : f32 to vector<64x128xf32>
    %33 = arith.cmpf oge, %31, %32 : vector<64x128xf32>
    %cst_13 = arith.constant 0.00999999977 : f32
    %34 = vector.broadcast %cst_13 : f32 to vector<64x128xf32>
    %35 = arith.mulf %34, %31 : vector<64x128xf32>
    %36 = arith.select %33, %31, %35 : vector<64x128xi1>, vector<64x128xf32>
    %37 = vector.extract_strided_slice %4 {offsets = [0, 128], sizes = [64, 128], strides = [1, 1]} : vector<64x256xf32> to vector<64x128xf32>
    %38 = vector.extract_strided_slice %0 {offsets = [4, 0], sizes = [1, 128], strides = [1, 1]} : vector<6x128xf32> to vector<1x128xf32>
    %39 = vector.extract_strided_slice %0 {offsets = [5, 0], sizes = [1, 128], strides = [1, 1]} : vector<6x128xf32> to vector<1x128xf32>
    %cst_14 = arith.constant dense<0.000000e+00> : vector<128xf32>
    %40 = vector.multi_reduction <add>, %37, %cst_14 [0] : vector<64x128xf32> to vector<128xf32>
    %41 = vector.shape_cast %40 : vector<128xf32> to vector<1x128xf32>
    %cst_15 = arith.constant 1.562500e-02 : f32
    %42 = vector.broadcast %cst_15 : f32 to vector<1x128xf32>
    %43 = arith.mulf %41, %42 : vector<1x128xf32>
    %44 = arith.mulf %37, %37 : vector<64x128xf32>
    %cst_16 = arith.constant dense<0.000000e+00> : vector<128xf32>
    %45 = vector.multi_reduction <add>, %44, %cst_16 [0] : vector<64x128xf32> to vector<128xf32>
    %46 = vector.shape_cast %45 : vector<128xf32> to vector<1x128xf32>
    %cst_17 = arith.constant 1.562500e-02 : f32
    %47 = vector.broadcast %cst_17 : f32 to vector<1x128xf32>
    %48 = arith.mulf %46, %47 : vector<1x128xf32>
    %49 = arith.mulf %43, %43 : vector<1x128xf32>
    %50 = arith.subf %48, %49 : vector<1x128xf32>
    %cst_18 = arith.constant 0.000000e+00 : f32
    %51 = vector.broadcast %cst_18 : f32 to vector<1x128xf32>
    %52 = arith.maximumf %50, %51 : vector<1x128xf32>
    %53 = vector.broadcast %43 : vector<1x128xf32> to vector<64x128xf32>
    %54 = arith.subf %37, %53 : vector<64x128xf32>
    %cst_19 = arith.constant 9.99999974E-6 : f32
    %55 = vector.broadcast %cst_19 : f32 to vector<1x128xf32>
    %56 = arith.addf %52, %55 : vector<1x128xf32>
    %57 = math.rsqrt %56 : vector<1x128xf32>
    %58 = vector.broadcast %57 : vector<1x128xf32> to vector<64x128xf32>
    %59 = arith.mulf %54, %58 : vector<64x128xf32>
    %60 = vector.broadcast %38 : vector<1x128xf32> to vector<64x128xf32>
    %61 = arith.mulf %59, %60 : vector<64x128xf32>
    %62 = vector.broadcast %39 : vector<1x128xf32> to vector<64x128xf32>
    %63 = arith.addf %61, %62 : vector<64x128xf32>
    %64 = tpu.iota {dimensions = array<i32: 0>} : vector<64x1xi32>
    %c8_i32 = arith.constant 8 : i32
    %c0_i32 = arith.constant 0 : i32
    %65 = arith.cmpi eq, %c8_i32, %c0_i32 : i32
    %c1_i32 = arith.constant 1 : i32
    %66 = arith.select %65, %c1_i32, %c8_i32 : i32
    %67 = vector.broadcast %66 : i32 to vector<64x1xi32>
    %68 = arith.remsi %64, %67 : vector<64x1xi32>
    %c0_i32_20 = arith.constant 0 : i32
    %69 = vector.broadcast %c0_i32_20 : i32 to vector<64x1xi32>
    %70 = arith.cmpi ne, %68, %69 : vector<64x1xi32>
    %c0_i32_21 = arith.constant 0 : i32
    %71 = vector.broadcast %c0_i32_21 : i32 to vector<64x1xi32>
    %72 = arith.cmpi slt, %68, %71 : vector<64x1xi32>
    %c0_i32_22 = arith.constant 0 : i32
    %73 = arith.cmpi slt, %66, %c0_i32_22 : i32
    %74 = vector.broadcast %73 : i1 to vector<64x1xi1>
    %75 = vector.broadcast %74 : vector<64x1xi1> to vector<64x1xi1>
    %76 = arith.xori %72, %75 : vector<64x1xi1>
    %77 = arith.andi %76, %70 : vector<64x1xi1>
    %78 = vector.broadcast %66 : i32 to vector<64x1xi32>
    %79 = arith.addi %68, %78 : vector<64x1xi32>
    %80 = arith.select %77, %79, %68 : vector<64x1xi1>, vector<64x1xi32>
    %c7_i32 = arith.constant 7 : i32
    %81 = vector.broadcast %c7_i32 : i32 to vector<64x1xi32>
    %82 = arith.cmpi eq, %80, %81 : vector<64x1xi32>
    %cst_23 = arith.constant 0.000000e+00 : f32
    %83 = vector.shape_cast %82 : vector<64x1xi1> to vector<64x1xi1>
    %84 = vector.broadcast %83 : vector<64x1xi1> to vector<64x128xi1>
    %85 = vector.broadcast %cst_23 : f32 to vector<64x128xf32>
    %86 = arith.select %84, %85, %36 : vector<64x128xi1>, vector<64x128xf32>
    %c0_i32_24 = arith.constant 0 : i32
    %87 = vector.broadcast %c0_i32_24 : i32 to vector<64x1xi32>
    %88 = arith.cmpi eq, %80, %87 : vector<64x1xi32>
    %cst_25 = arith.constant 0.000000e+00 : f32
    %89 = vector.shape_cast %88 : vector<64x1xi1> to vector<64x1xi1>
    %90 = vector.broadcast %89 : vector<64x1xi1> to vector<64x128xi1>
    %91 = vector.broadcast %cst_25 : f32 to vector<64x128xf32>
    %92 = arith.select %90, %91, %36 : vector<64x128xi1>, vector<64x128xf32>
    %c1_i32_26 = arith.constant 1 : i32
    %93 = tpu.dynamic_rotate %86 by %c1_i32_26 dim 0 : vector<64x128xf32>, i32 -> vector<64x128xf32>
    %c63_i32 = arith.constant 63 : i32
    %94 = tpu.dynamic_rotate %92 by %c63_i32 dim 0 : vector<64x128xf32>, i32 -> vector<64x128xf32>
    %95 = arith.truncf %93 : vector<64x128xf32> to vector<64x128xbf16>
    %96 = arith.truncf %36 : vector<64x128xf32> to vector<64x128xbf16>
    %97 = arith.truncf %94 : vector<64x128xf32> to vector<64x128xbf16>
    %98 = tpu.concatenate %95, %96, %97 in 1 : vector<64x128xbf16>, vector<64x128xbf16>, vector<64x128xbf16> -> vector<64x384xbf16>
    %c0_27 = arith.constant 0 : index
    %c0_28 = arith.constant 0 : index
    %c0_29 = arith.constant 0 : index
    %99 = vector.load %arg3[%c0_27, %c0_28, %c0_29] : memref<3x384x128xbf16, #tpu.memory_space<vmem>>, vector<1x384x128xbf16>
    %100 = vector.shape_cast %99 : vector<1x384x128xbf16> to vector<384x128xbf16>
    %cst_30 = arith.constant dense<0.000000e+00> : vector<64x128xf32>
    %101 = tpu.matmul %98, %100, %cst_30 {dimension_numbers = #tpu.dot_dimension_numbers<[1], [0], [0], [1], [0, 0, 1, 1], [], []>} : vector<64x384xbf16>, vector<384x128xbf16>, vector<64x128xf32> -> vector<64x128xf32>
    %c1 = arith.constant 1 : index
    %c0_31 = arith.constant 0 : index
    %c0_32 = arith.constant 0 : index
    %102 = vector.load %arg3[%c1, %c0_31, %c0_32] : memref<3x384x128xbf16, #tpu.memory_space<vmem>>, vector<1x384x128xbf16>
    %103 = vector.shape_cast %102 : vector<1x384x128xbf16> to vector<384x128xbf16>
    %cst_33 = arith.constant dense<0.000000e+00> : vector<64x128xf32>
    %104 = tpu.matmul %98, %103, %cst_33 {dimension_numbers = #tpu.dot_dimension_numbers<[1], [0], [0], [1], [0, 0, 1, 1], [], []>} : vector<64x384xbf16>, vector<384x128xbf16>, vector<64x128xf32> -> vector<64x128xf32>
    %c2 = arith.constant 2 : index
    %c0_34 = arith.constant 0 : index
    %c0_35 = arith.constant 0 : index
    %105 = vector.load %arg3[%c2, %c0_34, %c0_35] : memref<3x384x128xbf16, #tpu.memory_space<vmem>>, vector<1x384x128xbf16>
    %106 = vector.shape_cast %105 : vector<1x384x128xbf16> to vector<384x128xbf16>
    %cst_36 = arith.constant dense<0.000000e+00> : vector<64x128xf32>
    %107 = tpu.matmul %98, %106, %cst_36 {dimension_numbers = #tpu.dot_dimension_numbers<[1], [0], [0], [1], [0, 0, 1, 1], [], []>} : vector<64x384xbf16>, vector<384x128xbf16>, vector<64x128xf32> -> vector<64x128xf32>
    %cst_37 = arith.constant 0.000000e+00 : f32
    %108 = vector.broadcast %cst_37 : f32 to vector<8x128xf32>
    %109 = vector.extract_strided_slice %101 {offsets = [0, 0], sizes = [56, 128], strides = [1, 1]} : vector<64x128xf32> to vector<56x128xf32>
    %110 = tpu.concatenate %108, %109 in 0 : vector<8x128xf32>, vector<56x128xf32> -> vector<64x128xf32>
    %111 = arith.addf %104, %110 : vector<64x128xf32>
    %112 = vector.extract_strided_slice %107 {offsets = [8, 0], sizes = [56, 128], strides = [1, 1]} : vector<64x128xf32> to vector<56x128xf32>
    %113 = tpu.concatenate %112, %108 in 0 : vector<56x128xf32>, vector<8x128xf32> -> vector<64x128xf32>
    %114 = arith.addf %111, %113 : vector<64x128xf32>
    %115 = vector.extract_strided_slice %0 {offsets = [2, 0], sizes = [1, 128], strides = [1, 1]} : vector<6x128xf32> to vector<1x128xf32>
    %116 = vector.extract_strided_slice %0 {offsets = [3, 0], sizes = [1, 128], strides = [1, 1]} : vector<6x128xf32> to vector<1x128xf32>
    %cst_38 = arith.constant dense<0.000000e+00> : vector<128xf32>
    %117 = vector.multi_reduction <add>, %114, %cst_38 [0] : vector<64x128xf32> to vector<128xf32>
    %118 = vector.shape_cast %117 : vector<128xf32> to vector<1x128xf32>
    %cst_39 = arith.constant 1.562500e-02 : f32
    %119 = vector.broadcast %cst_39 : f32 to vector<1x128xf32>
    %120 = arith.mulf %118, %119 : vector<1x128xf32>
    %121 = arith.mulf %114, %114 : vector<64x128xf32>
    %cst_40 = arith.constant dense<0.000000e+00> : vector<128xf32>
    %122 = vector.multi_reduction <add>, %121, %cst_40 [0] : vector<64x128xf32> to vector<128xf32>
    %123 = vector.shape_cast %122 : vector<128xf32> to vector<1x128xf32>
    %cst_41 = arith.constant 1.562500e-02 : f32
    %124 = vector.broadcast %cst_41 : f32 to vector<1x128xf32>
    %125 = arith.mulf %123, %124 : vector<1x128xf32>
    %126 = arith.mulf %120, %120 : vector<1x128xf32>
    %127 = arith.subf %125, %126 : vector<1x128xf32>
    %cst_42 = arith.constant 0.000000e+00 : f32
    %128 = vector.broadcast %cst_42 : f32 to vector<1x128xf32>
    %129 = arith.maximumf %127, %128 : vector<1x128xf32>
    %130 = vector.broadcast %120 : vector<1x128xf32> to vector<64x128xf32>
    %131 = arith.subf %114, %130 : vector<64x128xf32>
    %cst_43 = arith.constant 9.99999974E-6 : f32
    %132 = vector.broadcast %cst_43 : f32 to vector<1x128xf32>
    %133 = arith.addf %129, %132 : vector<1x128xf32>
    %134 = math.rsqrt %133 : vector<1x128xf32>
    %135 = vector.broadcast %134 : vector<1x128xf32> to vector<64x128xf32>
    %136 = arith.mulf %131, %135 : vector<64x128xf32>
    %137 = vector.broadcast %115 : vector<1x128xf32> to vector<64x128xf32>
    %138 = arith.mulf %136, %137 : vector<64x128xf32>
    %139 = vector.broadcast %116 : vector<1x128xf32> to vector<64x128xf32>
    %140 = arith.addf %138, %139 : vector<64x128xf32>
    %141 = arith.addf %140, %63 : vector<64x128xf32>
    %cst_44 = arith.constant 0.000000e+00 : f32
    %142 = vector.broadcast %cst_44 : f32 to vector<64x128xf32>
    %143 = arith.cmpf oge, %141, %142 : vector<64x128xf32>
    %cst_45 = arith.constant 0.00999999977 : f32
    %144 = vector.broadcast %cst_45 : f32 to vector<64x128xf32>
    %145 = arith.mulf %144, %141 : vector<64x128xf32>
    %146 = arith.select %143, %141, %145 : vector<64x128xi1>, vector<64x128xf32>
    %147 = arith.truncf %146 : vector<64x128xf32> to vector<64x128xbf16>
    %c0_46 = arith.constant 0 : index
    %c0_47 = arith.constant 0 : index
    %c0_48 = arith.constant 0 : index
    %148 = vector.load %arg5[%c0_46, %c0_47, %c0_48] : memref<1x64x128xbf16, #tpu.memory_space<vmem>>, vector<1x64x128xbf16>
    %149 = vector.shape_cast %148 : vector<1x64x128xbf16> to vector<64x128xbf16>
    %150 = vector.shape_cast %147 : vector<64x128xbf16> to vector<1x64x128xbf16>
    tpu.vector_store %arg5[%c0_46, %c0_47, %c0_48], %150 {strides = array<i32>} : memref<1x64x128xbf16, #tpu.memory_space<vmem>>, vector<1x64x128xbf16>,
    return
  }
  func.func @transform_0(%arg0: i32) -> (i32, i32, i32) {
    %c0_i32 = arith.constant 0 : i32
    %c0_i32_0 = arith.constant 0 : i32
    %c0_i32_1 = arith.constant 0 : i32
    return %arg0, %c0_i32, %c0_i32_0 : i32, i32, i32
  }
  func.func @transform_1(%arg0: i32) -> (i32, i32) {
    %c0_i32 = arith.constant 0 : i32
    %c0_i32_0 = arith.constant 0 : i32
    %c0_i32_1 = arith.constant 0 : i32
    return %c0_i32, %c0_i32_0 : i32, i32
  }
  func.func @transform_2(%arg0: i32) -> (i32, i32, i32) {
    %c0_i32 = arith.constant 0 : i32
    %c0_i32_0 = arith.constant 0 : i32
    %c0_i32_1 = arith.constant 0 : i32
    %c0_i32_2 = arith.constant 0 : i32
    return %c0_i32, %c0_i32_0, %c0_i32_1 : i32, i32, i32
  }
  func.func @transform_3(%arg0: i32) -> (i32, i32) {
    %c0_i32 = arith.constant 0 : i32
    %c0_i32_0 = arith.constant 0 : i32
    %c0_i32_1 = arith.constant 0 : i32
    return %c0_i32, %c0_i32_0 : i32, i32
  }
  func.func @transform_4(%arg0: i32) -> (i32, i32, i32) {
    %c0_i32 = arith.constant 0 : i32
    %c0_i32_0 = arith.constant 0 : i32
    %c0_i32_1 = arith.constant 0 : i32
    return %arg0, %c0_i32, %c0_i32_0 : i32, i32, i32
  }
}

</mosaic_0001>

<bundles_post_ra>
// kernel: res_stride_block.1
= control target key start
LH: loop header
LB: loop body
LE: loop exit
PB: predicated region body
PF: predicated region fallthrough
CT: control target
= control target key end

     0   :  { %9 = vsyncpa [#allocation3], 0  ;;  %s3717_s0 = inlined_call_operand.hbm [shape: bf16[2,64,128], index: 0, kind: input, shape index: {}]   ;;  %s3718_s1 = inlined_call_operand.hbm [shape: bf16[128,256], index: 1, kind: input, shape index: {}]   ;;  %s3719_s2 = inlined_call_operand.hbm [shape: bf16[3,384,128], index: 2, kind: input, shape index: {}]   ;;  %s3720_s3 = inlined_call_operand.hbm [shape: f32[6,128], index: 3, kind: input, shape index: {}]   ;;  %s3721_s4 = inlined_call_operand.hbm [shape: bf16[2,64,128], index: 4, kind: output, shape index: {}]  }
   0x1   :  { %11 = vsyncpa [#allocation3 + $0x1], 0 }
   0x2   :  { %12 = vsyncpa [#allocation6], 0 }
   0x3   :  { %13 = vsyncpa [#allocation9], 0 }
   0x4   :  { %14 = vsyncpa [#allocation4], 0 }
   0x5   :  { %16 = vsyncpa [#allocation4 + $0x1], 0  ;;  %s2917_s15 = smov 0   ;;  %s2919_s16 = smov 0  }
   0x6   :  { %s2921_s17 = smov 0   ;;  %s2923_s18 = smov 0  }
   0x7 LB: > { %s2938_s19 = sadd.s32 4294967295, %s2878_s18   ;;  %s2103_s20 = sadd.s32 4294967294, %s2878_s18   ;;  %s2878_s18 = sphi %s2923_s18, %s3794_s18   ;;  %s2874_s17 = sphi %s2921_s17, %s3793_s17   ;;  %s2870_s16 = sphi %s2919_s16, %s3792_s16   ;;  %s2866_s15 = sphi %s2917_s15, %s3791_s15  }
   0x8   : > { %p42_p0 = scmp.ne.s32.totalorder %s2870_s16, %s2866_s15  ;;  %p3722_p1 = scmp.eq.s32.totalorder %s2938_s19, 0 }
   0x9   : > { %p135_p3 = scmp.eq.s32.totalorder %s2103_s20, 1  ;;  %p2104_p5 = scmp.ge.s32.totalorder %s2878_s18, 1 }
   0xa   : > { %p2947_p4 = por %p3722_p1, %p42_p0  ;;  %p142_p7 = scmp.lt.s32.totalorder %s2878_s18, 3 }
   0xb   : > { %p2952_p6 = por %p135_p3, %p42_p0  ;;  %s2880_s24 = smov [#allocation5]  }
   0xc   : > { %s3725_s21 = scalar_select %p2947_p4, 1, 0 }
   0xd   : > { %s3726_s22 = scalar_select %p2952_p6, 1, 0 }
   0xe   : > { %p2957_p8 = pnand %p2104_p5, %p142_p7  ;;  %s154_s25 = sshll.u32 %s2880_s24, 4  ;;  %s2961_s25 = int_to_ptr.vmem [resolvable:$true] %s154_s25 }
   0xf   : > { %s2881_s27 = smov [#allocation7]   ;;  %s2690_s5 = scalar_lea.hbm %s3718_s1, 2048 }
  0x10   : > { %s3727_s23 = scalar_select %p2957_p8, 1, 0 }
  0x11   : > { %p2516_p9 = pneg %p2957_p8  ;;  %s167_s28 = sshll.u32 %s2881_s27, 4  ;;  %s2972_s28 = int_to_ptr.vmem [resolvable:$true] %s167_s28 }
  0x12   : > { %p2691_p12 = scmp.ne.s32.totalorder %s3718_s1, %s2690_s5  ;;  %p2697_p5 = scmp.lt.u32.totalorder %s2690_s5, %s3718_s1 }
  0x13   : > { %p2968_p11 = pnand %p2516_p9, %p3722_p1 }
  0x15   : > { %p2982_p13 = pneg %p2968_p11 }
  0x17   : > { %p2693_p0 = pnand %p2982_p13, %p2691_p12 }
  0x19   : > { %p2694_p3 = pneg %p2693_p0 }
  0x1b   : > { %p2699_p7 = pnand %p2697_p5, %p2694_p3 }
  0x1d   : > { %2702 = shalt.err (!%p2699_p7)
}
  0x1e   : > { %s2703_s11 = scalar_lea.vmem %s2961_s25, 2048  ;;  %p2711_p2 = scmp.lt.s32.totalorder %s2961_s25, %s2961_s25 }
  0x1f   : > { %p2704_p9 = scmp.ne.s32.totalorder %s2961_s25, %s2703_s11  ;;  %p2712_p6 = scmp.lt.s32.totalorder %s2703_s11, %s2703_s11 }
  0x21   : > { %p2706_p10 = pnand %p2704_p9, %p2982_p13  ;;  %p2713_p12 = por %p2712_p6, %p2711_p2 }
  0x23   : > { %p2707_p1 = pneg %p2706_p10 }
  0x25   : > { %p2714_p0 = pnand %p2713_p12, %p2707_p1 }
  0x27   : > { %2717 = shalt.err (!%p2714_p0)
}
  0x28   : > { %s2882_s12 = smov 128   ;;  %s2883_s13 = smov 8  }
  0x29   : > { %2519 = dma.hbm_to_vmem [thread:$0]  (!%p2968_p11), %s3718_s1, 2048, %s2961_s25, [#allocation6], %s2882_s12, %s2882_s12, %s2883_s13  }
  0x2a   : > { %s2718_s29 = scalar_lea.hbm %s3719_s2, 9216 }
  0x2b   : > { %p2719_p2 = scmp.ne.s32.totalorder %s3719_s2, %s2718_s29  ;;  %p2725_p10 = scmp.lt.u32.totalorder %s2718_s29, %s3719_s2 }
  0x2d   : > { %p2721_p1 = pnand %p2719_p2, %p2982_p13 }
  0x2f   : > { %p2722_p6 = pneg %p2721_p1 }
  0x31   : > { %p2727_p3 = pnand %p2725_p10, %p2722_p6 }
  0x33   : > { %2730 = shalt.err (!%p2727_p3)
}
  0x34   : > { %s2731_s25 = scalar_lea.vmem %s2972_s28, 9216  ;;  %p2739_p12 = scmp.lt.s32.totalorder %s2972_s28, %s2972_s28 }
  0x35   : > { %p2732_p5 = scmp.ne.s32.totalorder %s2972_s28, %s2731_s25  ;;  %p2740_p0 = scmp.lt.s32.totalorder %s2731_s25, %s2731_s25 }
  0x37   : > { %p2734_p7 = pnand %p2732_p5, %p2982_p13  ;;  %p2741_p2 = por %p2740_p0, %p2739_p12 }
  0x39   : > { %p2735_p9 = pneg %p2734_p7 }
  0x3b   : > { %p2742_p1 = pnand %p2741_p2, %p2735_p9 }
  0x3d   : > { %2745 = shalt.err (!%p2742_p1)
}
  0x3e   : > { %s2884_s9 = smov 64   ;;  %s2885_s10 = smov 4  }
  0x3f   : > { %2522 = dma.hbm_to_vmem [thread:$0]  (!%p2968_p11), %s3719_s2, 9216, %s2972_s28, [#allocation6], %s2884_s9, %s2884_s9, %s2885_s10  }
  0x40   : > { %s2886_s13 = smov [#allocation8]   ;;  %s3030_s20 = sadd.s32 1, %s2878_s18  }
  0x41   : > { %s181_s14 = sshll.u32 %s2886_s13, 4  ;;  %s2746_s29 = scalar_lea.hbm %s3720_s3, 128  ;;  %s182_s14 = int_to_ptr.vmem [resolvable:$true] %s181_s14 }
  0x42   : > { %p2747_p6 = scmp.ne.s32.totalorder %s3720_s3, %s2746_s29  ;;  %p2753_p5 = scmp.lt.u32.totalorder %s2746_s29, %s3720_s3 }
  0x44   : > { %p2749_p10 = pnand %p2747_p6, %p2982_p13 }
  0x46   : > { %p2750_p3 = pneg %p2749_p10 }
  0x48   : > { %p2755_p7 = pnand %p2753_p5, %p2750_p3 }
  0x4a   : > { %2758 = shalt.err (!%p2755_p7)
}
  0x4b   : > { %s2759_s28 = scalar_lea.vmem %s182_s14, 128  ;;  %p2767_p2 = scmp.lt.s32.totalorder %s182_s14, %s182_s14 }
  0x4c   : > { %p2760_p9 = scmp.ne.s32.totalorder %s182_s14, %s2759_s28  ;;  %p2768_p1 = scmp.lt.s32.totalorder %s2759_s28, %s2759_s28 }
  0x4e   : > { %p2762_p12 = pnand %p2760_p9, %p2982_p13  ;;  %p2769_p4 = por %p2768_p1, %p2767_p2 }
  0x50   : > { %p2763_p0 = pneg %p2762_p12 }
  0x52   : > { %p2770_p8 = pnand %p2769_p4, %p2763_p0 }
  0x54   : > { %2773 = shalt.err (!%p2770_p8)
}
  0x55   : > { %2525 = dma.hbm_to_vmem [thread:$0]  (!%p2968_p11), %s3720_s3, 128, %s182_s14, [#allocation9]  }
  0x56   : > { %s26_s8 = ssub.s32 %s2878_s18, %s3030_s20  ;;  %s29_s12 = sadd.s32 1, %s2874_s17 }
  0x57   : > { %p27_p4 = scmp.eq.s32.totalorder %s26_s8, 0  ;;  %p36_p8 = scmp.ne.s32.totalorder %s2874_s17, %s2870_s16 }
  0x58   : > { %p37_p13 = scmp.eq.s32.totalorder %s2878_s18, 0  ;;  %p2537_p6 = scmp.lt.s32.totalorder %s2878_s18, 2 }
  0x59   : > { %s3058_s26 = scalar_select %p27_p4, %s2874_s17, %s29_s12  }
  0x5a   : > { %p38_p10 = por %p37_p13, %p36_p8  ;;  %p3730_p3 = scmp.eq.s32.totalorder %s2938_s19, 1 }
  0x5b   : > { %s192_s24 = sand.u32 1, %s2874_s17   ;;  %s2223_s27 = sshll.u32 %s2878_s18, 9 }
  0x5c   : > { %p3062_p5 = por %p3730_p3, %p36_p8  ;;  %s2109_s29 = sshll.u32 %s192_s24, 5 }
  0x5d   : > { %s3071_s14 = scalar_lea.hbm %s3717_s0, %s2223_s27  ;;  %s196_s6 = scalar_lea.vmem [#allocation2], %s2109_s29 }
  0x5e   : > { %s203_s7 = sshll.u32 %s196_s6, 4  ;;  %p3073_p11 = pnand %p2537_p6, %p38_p10  ;;  %s3077_s7 = int_to_ptr.vmem [resolvable:$true] %s203_s7 }
  0x5f   : > { %s3079_s25 = scalar_lea.sflag [#allocation3], %s192_s24  ;;  %s2774_s11 = scalar_lea.hbm %s3071_s14, 512 }
  0x60   : > { %p2775_p7 = scmp.ne.s32.totalorder %s3071_s14, %s2774_s11  ;;  %p2776_p9 = pneg %p3073_p11 }
  0x61   : > { %s2779_s27 = scalar_lea.hbm %s3717_s0, 1024  ;;  %p2780_p2 = scmp.lt.u32.totalorder %s3071_s14, %s3717_s0 }
  0x62   : > { %p2777_p12 = pnand %p2776_p9, %p2775_p7  ;;  %p2781_p1 = scmp.lt.u32.totalorder %s2779_s27, %s2774_s11 }
  0x63   : > { %p2783_p8 = scmp.lt.u32.totalorder %s2774_s11, %s3071_s14 }
  0x64   : > { %p2778_p0 = pneg %p2777_p12  ;;  %p2782_p4 = por %p2781_p1, %p2780_p2 }
  0x66   : > { %p2784_p13 = por %p2783_p8, %p2782_p4 }
  0x68   : > { %p2785_p6 = pnand %p2784_p13, %p2778_p0 }
  0x6a   : > { %2788 = shalt.err (!%p2785_p6)
}
  0x6b   : > { %s2789_s24 = scalar_lea.vmem %s3077_s7, 512  ;;  %s2887_s5 = smov [#allocation2]  }
  0x6c   : > { %p2790_p10 = scmp.ne.s32.totalorder %s3077_s7, %s2789_s24  ;;  %s2794_s6 = sshll.u32 %s2887_s5, 4  ;;  %s2795_s6 = int_to_ptr.vmem [resolvable:$false] %s2794_s6 }
  0x6d   : > { %s2796_s8 = scalar_lea.vmem %s2795_s6, 1024  ;;  %p2797_p12 = scmp.lt.s32.totalorder %s3077_s7, %s2795_s6 }
  0x6e   : > { %p2792_p3 = pnand %p2790_p10, %p2776_p9  ;;  %p2798_p2 = scmp.lt.s32.totalorder %s2796_s8, %s2789_s24 }
  0x70   : > { %p2793_p7 = pneg %p2792_p3  ;;  %p2799_p1 = por %p2798_p2, %p2797_p12 }
  0x72   : > { %p2800_p4 = pnand %p2799_p1, %p2793_p7 }
  0x74   : > { %2803 = shalt.err (!%p2800_p4)
}
  0x75   : > { %2529 = dma.hbm_to_vmem [thread:$0]  (!%p3073_p11), %s3071_s14, 512, %s3077_s7, %s3079_s25, %s2884_s9, %s2884_s9, %s2885_s10  }
  0x76   : > { %p3733_p9 = scmp.ne.s32.totalorder %s3727_s23, 0 }
  0x77   : > { %s3113_s11 = sand.u32 (!%p3733_p9), 1, %s2870_s16   ;;  %p3734_p0 = scmp.ne.s32.totalorder (!%p3733_p9), %s3725_s21, 0 }
  0x78   : > { %215 = sbr.rel (%p3733_p9) target bundleno = 846 (0x34e), region = 36  ;;  %s2113_s12 = sshll.u32 (!%p3733_p9), %s3113_s11, 5 }
  0x79   : > { %s218_s27 = scalar_lea.sflag (!%p3733_p9), [#allocation3], %s3113_s11  ;;  %s3119_s28 = scalar_lea.vmem (!%p3733_p9), [#allocation2], %s2113_s12 }
  0x7f   : > { %2849 = dma.done.wait (%p3734_p0), %s218_s27, 512  }
  0x80   : > { %2851 = vsyncadd (%p3734_p0), %s218_s27, 4294966784  ;;  %p3735_p11 = scmp.eq.s32.totalorder %s2938_s19, 0 }
  0x82   : > { %2853 = dma.done.wait (%p3735_p11), [#allocation6], 11264   ;;  %p3736_p8 = pmov %p3735_p11 }
  0x84   : > { %2855 = vsyncadd (%p3736_p8), [#allocation6], 4294956032  ;;  %p3737_p13 = pmov %p3736_p8 }
  0x85   : > { %p3738_p6 = pmov %p3736_p8 }
  0x86   : > { %2857 = dma.done.wait (%p3737_p13), [#allocation9], 128  }
  0x87   : > { %2859 = vsyncadd (%p3738_p6), [#allocation9], 4294967168  ;;  %v2888_v0 = vmov 0   ;;  %v2584_v1 = vld [vmem:[#allocation5 + $0x4] ss:$8 sps:$4 sm:$0xff]   ;;  %v2610_v19 = vld [vmem:[%s3119_s28 + $0x10] sm:$0xff]  }
  0x88   : > { %420 = vmatprep.mubr.bf16.mxu0 %v2888_v0  ;;  %v2586_v2 = vld [vmem:[#allocation5] ss:$8 sps:$4 sm:$0xff]   ;;  %388 = vmatprep.subr.bf16.mxu0 %v2584_v1  ;;  %v2587_v3 = vld [vmem:[#allocation5 + $0x14] ss:$8 sps:$4 sm:$0xff]   ;;  %v2589_v4 = vld [vmem:[#allocation5 + $0x10] ss:$8 sps:$4 sm:$0xff]  }
  0x89   : > { %389 = vmatpush1.bf16.msra.mxu0 %v2586_v2  ;;  %v2590_v5 = vld [vmem:[#allocation5 + $0x24] ss:$8 sps:$4 sm:$0xff]   ;;  %v2592_v6 = vld [vmem:[#allocation5 + $0x20] ss:$8 sps:$4 sm:$0xff]   ;;  %v2593_v7 = vld [vmem:[#allocation5 + $0x34] ss:$8 sps:$4 sm:$0xff]  }
  0x8a   : > { %390 = vmatprep.subr.bf16.mxu0 %v2587_v3  ;;  %v2595_v8 = vld [vmem:[#allocation5 + $0x30] ss:$8 sps:$4 sm:$0xff]   ;;  %v2596_v9 = vld [vmem:[#allocation5 + $0x44] ss:$8 sps:$4 sm:$0xff]   ;;  %v2598_v10 = vld [vmem:[#allocation5 + $0x40] ss:$8 sps:$4 sm:$0xff]  }
  0x8b   : > { %v2599_v11 = vld [vmem:[#allocation5 + $0x54] ss:$8 sps:$4 sm:$0xff]   ;;  %v2601_v12 = vld [vmem:[#allocation5 + $0x50] ss:$8 sps:$4 sm:$0xff]   ;;  %v2602_v13 = vld [vmem:[#allocation5 + $0x64] ss:$8 sps:$4 sm:$0xff]  }
  0x8c   : > { %v2604_v14 = vld [vmem:[#allocation5 + $0x60] ss:$8 sps:$4 sm:$0xff]   ;;  %v2605_v15 = vld [vmem:[#allocation5 + $0x74] ss:$8 sps:$4 sm:$0xff]   ;;  %v2607_v16 = vld [vmem:[#allocation5 + $0x70] ss:$8 sps:$4 sm:$0xff]  }
  0x8d   : > { %391 = vmatpush1.bf16.msra.mxu0 %v2589_v4  ;;  %v2608_v17 = vld [vmem:[%s3119_s28] sm:$0xff]   ;;  %v2609_v18 = vld [vmem:[%s3119_s28 + $0x8] sm:$0xff]   ;;  %v2611_v20 = vld [vmem:[%s3119_s28 + $0x18] sm:$0xff]   ;;  %s2232_s21 = sshll.u32 %s2938_s19, 9  ;;  %s257_s23 = scalar_lea.vmem [#allocation10], %s2113_s12 }
  0x8e   : > { %392 = vmatprep.subr.bf16.mxu0 %v2590_v5  ;;  %v2612_v21 = vld [vmem:[#allocation7 + $0x40] sm:$0xff]   ;;  %v2615_v24 = vld [vmem:[#allocation7 + $0x48] sm:$0xff]   ;;  %v2618_v27 = vld [vmem:[#allocation7 + $0x50] sm:$0xff]   ;;  %s2001_s9 = sshll.u32 %s257_s23, 4  ;;  %s3671_s14 = scalar_lea.hbm %s3721_s4, %s2232_s21  ;;  %s3673_s9 = int_to_ptr.vmem [resolvable:$true] %s2001_s9 }
  0x8f   : > { %v2614_v22 = vld [vmem:[#allocation7 + $0x80] sm:$0xff]   ;;  %2256 = vmatprep.subr.bf16.mxu1 %v2612_v21  ;;  %v2617_v25 = vld [vmem:[#allocation7 + $0x88] sm:$0xff]   ;;  %v2620_v28 = vld [vmem:[#allocation7 + $0x90] sm:$0xff]   ;;  %s1988_s7 = scalar_lea.sflag [#allocation4], %s3113_s11  ;;  %s2804_s25 = scalar_lea.vmem %s3673_s9, 512 }
  0x90   : > { %v2613_v23 = vld [vmem:[#allocation7] sm:$0xff]   ;;  %v2616_v26 = vld [vmem:[#allocation7 + $0x8] sm:$0xff]   ;;  %v2619_v29 = vld [vmem:[#allocation7 + $0x10] sm:$0xff]   ;;  %p2805_p10 = scmp.ne.s32.totalorder %s3673_s9, %s2804_s25  ;;  %s2889_s29 = smov [#allocation10]  }
  0x91   : > { %393 = vmatpush1.bf16.msra.mxu0 %v2592_v6  ;;  %2257 = vmatpush3.bf16.msra.mxu1 %v2613_v23  ;;  %v2621_v30 = vld [vmem:[#allocation7 + $0x58] sm:$0xff]   ;;  %v2624_v33 = vld [vmem:[#allocation7 + $0x60] sm:$0xff]   ;;  %v2627_v36 = vld [vmem:[#allocation7 + $0x68] sm:$0xff]   ;;  %s2808_s30 = sshll.u32 %s2889_s29, 4  ;;  %s2809_s30 = int_to_ptr.vmem [resolvable:$false] %s2808_s30 }
  0x92   : > { %394 = vmatprep.subr.bf16.mxu0 %v2593_v7  ;;  %2258 = vmatprep.subr.bf16.mxu1 %v2615_v24  ;;  %v2623_v31 = vld [vmem:[#allocation7 + $0x98] sm:$0xff]   ;;  %v2626_v34 = vld [vmem:[#allocation7 + $0xa0] sm:$0xff]   ;;  %v2629_v37 = vld [vmem:[#allocation7 + $0xa8] sm:$0xff]   ;;  %p2806_p3 = pnand %p2805_p10, %p3062_p5  ;;  %s2810_s24 = scalar_lea.vmem %s2809_s30, 1024 }
  0x93   : > { %v2622_v32 = vld [vmem:[#allocation7 + $0x18] sm:$0xff]   ;;  %v2625_v35 = vld [vmem:[#allocation7 + $0x20] sm:$0xff]   ;;  %v2628_v38 = vld [vmem:[#allocation7 + $0x28] sm:$0xff]   ;;  %p2811_p12 = scmp.lt.s32.totalorder %s3673_s9, %s2809_s30  ;;  %p2812_p2 = scmp.lt.s32.totalorder %s2810_s24, %s2804_s25 }
  0x94   : > { %v2630_v39 = vld [vmem:[#allocation7 + $0x70] sm:$0xff]   ;;  %v2633_v42 = vld [vmem:[#allocation7 + $0x78] sm:$0xff]   ;;  %v2636_v45 = vld [vmem:[#allocation7 + $0x1c0] sm:$0xff]   ;;  %p2807_p7 = pneg %p2806_p3 }
  0x95   : > { %395 = vmatpush1.bf16.msra.mxu0 %v2595_v8  ;;  %2259 = vmatpush3.bf16.msra.mxu1 %v2616_v26  ;;  %v2632_v40 = vld [vmem:[#allocation7 + $0xb0] sm:$0xff]   ;;  %v2634_v43 = vld [vmem:[#allocation7 + $0x38] sm:$0xff]   ;;  %v3137_v46 = vld [vmem:[#allocation7 + $0x200] sm:$0xff]   ;;  %p2813_p1 = por %p2812_p2, %p2811_p12 }
  0x96   : > { %396 = vmatprep.subr.bf16.mxu0 %v2596_v9  ;;  %2260 = vmatprep.subr.bf16.mxu1 %v2618_v27  ;;  %v2631_v41 = vld [vmem:[#allocation7 + $0x30] sm:$0xff]   ;;  %v2635_v44 = vld [vmem:[#allocation7 + $0xb8] sm:$0xff]  }
  0x97   : > { %p2814_p4 = pnand %p2813_p1, %p2807_p7 }
  0x99   : > { %397 = vmatpush1.bf16.msra.mxu0 %v2598_v10  ;;  %2261 = vmatpush3.bf16.msra.mxu1 %v2619_v29 }
  0x9a   : > { %398 = vmatprep.subr.bf16.mxu0 %v2599_v11  ;;  %2262 = vmatprep.subr.bf16.mxu1 %v2621_v30 }
  0x9d   : > { %399 = vmatpush1.bf16.msra.mxu0 %v2601_v12  ;;  %2263 = vmatpush3.bf16.msra.mxu1 %v2622_v32 }
  0x9e   : > { %400 = vmatprep.subr.bf16.mxu0 %v2602_v13  ;;  %2264 = vmatprep.subr.bf16.mxu1 %v2624_v33 }
  0xa1   : > { %401 = vmatpush1.bf16.msra.mxu0 %v2604_v14  ;;  %2265 = vmatpush3.bf16.msra.mxu1 %v2625_v35 }
  0xa2   : > { %402 = vmatprep.subr.bf16.mxu0 %v2605_v15  ;;  %2266 = vmatprep.subr.bf16.mxu1 %v2627_v36 }
  0xa5   : > { %403 = vmatpush1.bf16.msra.mxu0 %v2607_v16  ;;  %2267 = vmatpush3.bf16.msra.mxu1 %v2628_v38 }
  0xa6   : > { %2412 = vmatprep.subr.bf16.mxu0 %v2614_v22  ;;  %2268 = vmatprep.subr.bf16.mxu1 %v2630_v39 }
  0xa8   : > { %421 = vmatmul.mubr.bf16.vlgmr.msra.gmra.mrb[0].mxu0 %v2608_v17 }
  0xa9   : > { %430 = vmatprep.mubr.bf16.mxu0 %v2888_v0  ;;  %2413 = vmatpush3.bf16.msra.mxu0 %v2614_v22 }
  0xaa   : > { %2414 = vmatprep.subr.bf16.mxu0 %v2617_v25  ;;  %2269 = vmatpush3.bf16.msra.mxu1 %v2631_v41 }
  0xab   : > { %2270 = vmatprep.subr.bf16.mxu1 %v2633_v42 }
  0xad   : > { %2415 = vmatpush3.bf16.msra.mxu0 %v2617_v25 }
  0xae   : > { %2416 = vmatprep.subr.bf16.mxu0 %v2620_v28  ;;  %2271 = vmatpush3.bf16.msra.mxu1 %v2634_v43 }
  0xaf   : > { %2308 = vmatprep.subr.bf16.mxu1 %v2636_v45 }
  0xb0   : > { %431 = vmatmul.mubr.bf16.gmra.mrb[4].mxu0 %v2609_v18 }
  0xb1   : > { %440 = vmatprep.mubr.bf16.mxu0 %v2888_v0  ;;  %2417 = vmatpush3.bf16.msra.mxu0 %v2620_v28 }
  0xb2   : > { %2418 = vmatprep.subr.bf16.mxu0 %v2623_v31 }
  0xb5   : > { %2419 = vmatpush3.bf16.msra.mxu0 %v2623_v31 }
  0xb6   : > { %2420 = vmatprep.subr.bf16.mxu0 %v2626_v34 }
  0xb8   : > { %441 = vmatmul.mubr.bf16.gmra.mrb[8].mxu0 %v2610_v19 }
  0xb9   : > { %450 = vmatprep.mubr.bf16.mxu0 %v2888_v0  ;;  %2421 = vmatpush3.bf16.msra.mxu0 %v2626_v34 }
  0xba   : > { %2422 = vmatprep.subr.bf16.mxu0 %v2629_v37 }
  0xbd   : > { %2423 = vmatpush3.bf16.msra.mxu0 %v2629_v37 }
  0xbe   : > { %2424 = vmatprep.subr.bf16.mxu0 %v2632_v40 }
  0xc0   : > { %451 = vmatmul.mubr.bf16.gmra.mrb[12].mxu0 %v2611_v20 }
  0xc1   : > { %2425 = vmatpush3.bf16.msra.mxu0 %v2632_v40 }
  0xc2   : > { %2426 = vmatprep.subr.bf16.mxu0 %v2635_v44 }
  0xc5   : > { %2427 = vmatpush3.bf16.msra.mxu0 %v2635_v44 }
  0xc6   : > { %2436 = vmatprep.subr.bf16.mxu0 %v3137_v46 }
 0x17b   : > { %v3140_v47 = vpop.f32.mrb[0].mxu0 }
 0x17c   : > { %v3142_v48 = vpop.f32.mrb[1].mxu0  ;;  %v475_v50 = vmul.f32 %v3140_v47, %v3140_v47 }
 0x17d   : > { %v3144_v49 = vpop.f32.mrb[2].mxu0  ;;  %v580_v54 = vmul.f32 %v3142_v48, %v3142_v48 }
 0x17e   : > { %v461_v51 = vadd.f32 %v3144_v49, %v3140_v47  ;;  %v476_v52 = vmul.f32 %v3144_v49, %v3144_v49  ;;  %v3152_v53 = vpop.f32.mrb[3].mxu0 }
 0x17f   : > { %v566_v55 = vadd.f32 %v3152_v53, %v3142_v48  ;;  %v581_v56 = vmul.f32 %v3152_v53, %v3152_v53 }
 0x180   : > { %v483_v57 = vadd.f32 %v476_v52, %v475_v50 }
 0x181   : > { %v588_v58 = vadd.f32 %v581_v56, %v580_v54 }
 0x183   : > { %v3160_v59 = vpop.f32.mrb[4].mxu0 }
 0x184   : > { %v462_v60 = vadd.f32 %v461_v51, %v3160_v59  ;;  %v477_v61 = vmul.f32 %v3160_v59, %v3160_v59  ;;  %v3165_v62 = vpop.f32.mrb[5].mxu0 }
 0x185   : > { %v567_v63 = vadd.f32 %v566_v55, %v3165_v62  ;;  %v582_v0 = vmul.f32 %v3165_v62, %v3165_v62  ;;  %v3170_v1 = vpop.f32.mrb[6].mxu0 }
 0x186   : > { %v484_v2 = vadd.f32 %v483_v57, %v477_v61  ;;  %v463_v3 = vadd.f32 %v462_v60, %v3170_v1  ;;  %v478_v4 = vmul.f32 %v3170_v1, %v3170_v1  ;;  %v3175_v5 = vpop.f32.mrb[7].mxu0 }
 0x187   : > { %v589_v6 = vadd.f32 %v588_v58, %v582_v0  ;;  %v568_v7 = vadd.f32 %v567_v63, %v3175_v5  ;;  %v583_v8 = vmul.f32 %v3175_v5, %v3175_v5 }
 0x188   : > { %v485_v9 = vadd.f32 %v484_v2, %v478_v4 }
 0x189   : > { %v590_v10 = vadd.f32 %v589_v6, %v583_v8 }
 0x18b   : > { %v3180_v11 = vpop.f32.mrb[8].mxu0 }
 0x18c   : > { %v464_v12 = vadd.f32 %v463_v3, %v3180_v11  ;;  %v479_v13 = vmul.f32 %v3180_v11, %v3180_v11  ;;  %v3185_v14 = vpop.f32.mrb[9].mxu0 }
 0x18d   : > { %v569_v15 = vadd.f32 %v568_v7, %v3185_v14  ;;  %v584_v16 = vmul.f32 %v3185_v14, %v3185_v14  ;;  %v3190_v17 = vpop.f32.mrb[10].mxu0 }
 0x18e   : > { %v486_v18 = vadd.f32 %v485_v9, %v479_v13  ;;  %v465_v19 = vadd.f32 %v464_v12, %v3190_v17  ;;  %v480_v20 = vmul.f32 %v3190_v17, %v3190_v17  ;;  %v3195_v21 = vpop.f32.mrb[11].mxu0  ;;  %v518_v13 = vlaneseq }
 0x18f   : > { %v591_v22 = vadd.f32 %v590_v10, %v584_v16  ;;  %v570_v23 = vadd.f32 %v569_v15, %v3195_v21  ;;  %v585_v24 = vmul.f32 %v3195_v21, %v3195_v21 }
 0x190   : > { %v487_v25 = vadd.f32 %v486_v18, %v480_v20 }
 0x191   : > { %v592_v26 = vadd.f32 %v591_v22, %v585_v24 }
 0x193   : > { %v3200_v27 = vpop.f32.mrb[12].mxu0 }
 0x194   : > { %v466_v28 = vadd.f32 %v465_v19, %v3200_v27  ;;  %v481_v29 = vmul.f32 %v3200_v27, %v3200_v27  ;;  %v3205_v30 = vpop.f32.mrb[13].mxu0 }
 0x195   : > { %v571_v31 = vadd.f32 %v570_v23, %v3205_v30  ;;  %v586_v32 = vmul.f32 %v3205_v30, %v3205_v30  ;;  %v3210_v33 = vpop.f32.mrb[14].mxu0 }
 0x196   : > { %v488_v34 = vadd.f32 %v487_v25, %v481_v29  ;;  %v467_v35 = vadd.f32 %v466_v28, %v3210_v33  ;;  %v482_v36 = vmul.f32 %v3210_v33, %v3210_v33  ;;  %v3215_v37 = vpop.f32.mrb[15].mxu0 }
 0x197   : > { %v593_v38 = vadd.f32 %v592_v26, %v586_v32  ;;  %v572_v39 = vadd.f32 %v571_v31, %v3215_v37  ;;  %v587_v40 = vmul.f32 %v3215_v37, %v3215_v37 }
 0x198   : > { %v468_v41 = vrot.slane %v467_v35, 4  ;;  %v489_v42 = vadd.f32 %v488_v34, %v482_v36 }
 0x199   : > { %v573_v43 = vrot.slane %v572_v39, 4  ;;  %v594_v44 = vadd.f32 %v593_v38, %v587_v40  ;;  %v3260_v40 = vshrl.u32 %v518_v13, 7 }
 0x19a   : > { %v469_v45 = vadd.f32 %v468_v41, %v467_v35  ;;  %v490_v50 = vrot.slane %v489_v42, 4 }
 0x19b   : > { %v574_v51 = vadd.f32 %v573_v43, %v572_v39  ;;  %v595_v52 = vrot.slane %v594_v44, 4  ;;  %v649_v41 = vadd.s32 8, %v3260_v40  ;;  %v520_v43 = vsub.s32 0, %v3260_v40 }
 0x19c   : > { %v470_v54 = vrot.slane %v469_v45, 2  ;;  %v491_v55 = vadd.f32 %v490_v50, %v489_v42  ;;  %v3264_v42 = vadd.s32 56, %v3260_v40  ;;  %v651_v50 = vadd.s32 24, %v3260_v40 }
 0x19d   : > { %v575_v56 = vrot.slane %v574_v51, 2  ;;  %v596_v57 = vadd.f32 %v595_v52, %v594_v44  ;;  %v532_v44 = vsub.s32 1, %v3260_v40  ;;  %v660_v52 = vand.u32 7, %v3260_v40 }
 0x19e   : > { %v471_v58 = vadd.f32 %v470_v54, %v469_v45  ;;  %v492_v60 = vrot.slane %v491_v55, 2  ;;  %v650_v45 = vadd.s32 16, %v3260_v40  ;;  %v667_v54 = vand.u32 7, %v649_v41 }
 0x19f   : > { %v576_v61 = vadd.f32 %v575_v56, %v574_v51  ;;  %v597_v63 = vrot.slane %v596_v57, 2  ;;  %v3270_v51 = vld [vmem:[#allocation8] sm:$0x3f]  ;;  %v652_v56 = vadd.s32 32, %v3260_v40  ;;  %vm3281_vm0 = vcmp.eq.s32.totalorder %v660_v52, 7 }
 0x1a0   : > { %v472_v0 = vrot.slane %v471_v58, 1  ;;  %v493_v2 = vadd.f32 %v492_v60, %v491_v55  ;;  %v709_v55 = vand.u32 7, %v3264_v42  ;;  %v674_v60 = vand.u32 7, %v650_v45 }
 0x1a1   : > { %v577_v3 = vrot.slane %v576_v61, 1  ;;  %v598_v4 = vadd.f32 %v597_v63, %v596_v57  ;;  %v3276_v57 = vrot.slane %v3270_v51, %v520_v43  ;;  %vm3285_vm1 = vcmp.eq.s32.totalorder %v667_v54, 7 }
 0x1a2   : > { %v473_v6 = vadd.f32 %v472_v0, %v471_v58  ;;  %v494_v7 = vrot.slane %v493_v2, 1  ;;  %v3279_v58 = vrot.slane %v3270_v51, %v532_v44  ;;  %vm3289_vm2 = vcmp.eq.s32.totalorder %v660_v52, 0 }
 0x1a3   : > { %v578_v8 = vadd.f32 %v577_v3, %v576_v61  ;;  %v599_v9 = vrot.slane %v598_v4, 1  ;;  %v681_v61 = vand.u32 7, %v651_v50  ;;  %vm3293_vm3 = vcmp.eq.s32.totalorder %v667_v54, 0 }
 0x1a4   : > { %v3220_v10 = vmul.f32 0.015625, %v473_v6  ;;  %v495_v12 = vadd.f32 %v494_v7, %v493_v2  ;;  %vm3297_vm4 = vcmp.eq.s32.totalorder %v709_v55, 7  ;;  %v688_v7 = vand.u32 7, %v652_v56 }
 0x1a5   : > { %v3222_v15 = vmul.f32 0.015625, %v578_v8  ;;  %v600_v16 = vadd.f32 %v599_v9, %v598_v4  ;;  %v3302_v8 = vadd.s32 40, %v3260_v40  ;;  %v3305_v9 = vadd.s32 48, %v3260_v40 }
 0x1a6   : > { %v496_v18 = vmul.f32 0.015625, %v495_v12  ;;  %v497_v19 = vmul.f32 %v3220_v10, %v3220_v10  ;;  %v507_v20 = vsub.f32 %v3210_v33, %v3220_v10  ;;  %v500_v22 = vsub.f32 %v3140_v47, %v3220_v10 }
 0x1a7   : > { %v601_v23 = vmul.f32 0.015625, %v600_v16  ;;  %v602_v24 = vmul.f32 %v3222_v15, %v3222_v15  ;;  %v612_v25 = vsub.f32 %v3215_v37, %v3222_v15  ;;  %v501_v26 = vsub.f32 %v3144_v49, %v3220_v10 }
 0x1a8   : > { %v498_v28 = vsub.f32 %v496_v18, %v497_v19  ;;  %v502_v29 = vsub.f32 %v3160_v59, %v3220_v10  ;;  %v503_v31 = vsub.f32 %v3170_v1, %v3220_v10  ;;  %v504_v47 = vsub.f32 %v3180_v11, %v3220_v10 }
 0x1a9   : > { %v603_v32 = vsub.f32 %v601_v23, %v602_v24  ;;  %v505_v33 = vsub.f32 %v3190_v17, %v3220_v10  ;;  %v506_v34 = vsub.f32 %v3200_v27, %v3220_v10  ;;  %v609_v49 = vsub.f32 %v3185_v14, %v3222_v15 }
 0x1aa   : > { %v499_v35 = vmax.f32 %v498_v28, 0.0  ;;  %v610_v59 = vsub.f32 %v3195_v21, %v3222_v15  ;;  %v605_v1 = vsub.f32 %v3142_v48, %v3222_v15  ;;  %v606_v11 = vsub.f32 %v3152_v53, %v3222_v15 }
 0x1ab   : > { %v604_v36 = vmax.f32 %v603_v32, 0.0  ;;  %v607_v17 = vsub.f32 %v3165_v62, %v3222_v15  ;;  %v608_v27 = vsub.f32 %v3175_v5, %v3222_v15  ;;  %v611_v37 = vsub.f32 %v3205_v30, %v3222_v15  ;;  %v2651_v62 = vld [vmem:[#allocation7 + $0x1e8] sm:$0xff]   ;;  %v2655_v15 = vld [vmem:[#allocation7 + $0x1b0] sm:$0xff]  }
 0x1ac   : > { %v508_v38 = vadd.f32 1e-05, %v499_v35  ;;  %vm3317_vm6 = vcmp.eq.s32.totalorder %v674_v60, 0  ;;  %vm3322_vm8 = vcmp.eq.s32.totalorder %v681_v61, 7  ;;  %vm3327_vm9 = vcmp.eq.s32.totalorder %v681_v61, 0  ;;  %v2652_v5 = vld [vmem:[#allocation7 + $0x1a8] sm:$0xff]  }
 0x1ad   : > { %v613_v39 = vadd.f32 1e-05, %v604_v36  ;;  %vm3341_vm10 = vcmp.eq.s32.totalorder %v688_v7, 0  ;;  %v3755_v45 = vmov 0  ;;  %v702_v50 = vand.u32 7, %v3305_v9  ;;  %v2653_v30 = vld [vmem:[#allocation7 + $0x228] sm:$0xff]  }
 0x1ae   : > { %2684 = vrsqrt.f32 %v508_v38  ;;  %v3756_v45 = vsel %vm3341_vm10, 4294967295, %v3755_v45  ;;  %vm3347_vm14 = vcmp.eq.s32.totalorder %v674_v60, 7  ;;  %vm3353_vm10 = vcmp.eq.s32.totalorder %v709_v55, 0 }
 0x1af   : > { %2686 = vrsqrt.f32 %v613_v39 }
 0x1b8   : > { %v2685_v63 = vpop.eup %2684 }
 0x1b9   : > { %v3307_v10 = vpop.eup %2686  ;;  %v517_v12 = vmul.f32 %v2685_v63, %v507_v20  ;;  %v510_v13 = vmul.f32 %v2685_v63, %v500_v22  ;;  %v511_v16 = vmul.f32 %v2685_v63, %v501_v26  ;;  %v512_v18 = vmul.f32 %v2685_v63, %v502_v29 }
 0x1ba   : > { %v3310_v19 = vmul.f32 %v3307_v10, %v612_v25  ;;  %v513_v23 = vmul.f32 %v2685_v63, %v503_v31  ;;  %v514_v24 = vmul.f32 %v2685_v63, %v504_v47  ;;  %v515_v28 = vmul.f32 %v2685_v63, %v505_v33 }
 0x1bb   : > { %v529_v32 = vmul.f32 %v3276_v57, %v517_v12  ;;  %v522_v35 = vmul.f32 %v3276_v57, %v510_v13  ;;  %v523_v36 = vmul.f32 %v3276_v57, %v511_v16  ;;  %v524_v38 = vmul.f32 %v3276_v57, %v512_v18 }
 0x1bc   : > { %v525_v25 = vmul.f32 %v3276_v57, %v513_v23  ;;  %v3753_v26 = vmov 0  ;;  %v526_v29 = vmul.f32 %v3276_v57, %v514_v24  ;;  %v3332_v31 = vmul.f32 %v2685_v63, %v506_v34 }
 0x1bd   : > { %v3754_v26 = vsel %vm3327_vm9, 4294967295, %v3753_v26  ;;  %v695_v47 = vand.u32 7, %v3302_v8  ;;  %v541_v33 = vadd.f32 %v3279_v58, %v529_v32  ;;  %v534_v39 = vadd.f32 %v3279_v58, %v522_v35 }
 0x1be   : > { %v535_v41 = vadd.f32 %v3279_v58, %v523_v36  ;;  %v536_v42 = vadd.f32 %v3279_v58, %v524_v38  ;;  %v537_v43 = vadd.f32 %v3279_v58, %v525_v25  ;;  %v538_v44 = vadd.f32 %v3279_v58, %v526_v29 }
 0x1bf   : > { %v527_v34 = vmul.f32 %v3276_v57, %v515_v28  ;;  %vm549_vm11 = vcmp.ge.f32.partialorder %v541_v33, 0.0  ;;  %v557_v52 = vmul.f32 0.01, %v541_v33  ;;  %vm542_vm12 = vcmp.ge.f32.partialorder %v534_v39, 0.0 }
 0x1c0   : > { %vm543_vm13 = vcmp.ge.f32.partialorder %v535_v41, 0.0  ;;  %v550_v56 = vmul.f32 0.01, %v534_v39  ;;  %v551_v61 = vmul.f32 0.01, %v535_v41  ;;  %vm544_vm15 = vcmp.ge.f32.partialorder %v536_v42, 0.0 }
 0x1c1   : > { %vm545_vm7 = vcmp.ge.f32.partialorder %v537_v43, 0.0  ;;  %v3351_v63 = vsel %vm549_vm11, %v541_v33, %v557_v52  ;;  %v552_v8 = vmul.f32 0.01, %v536_v42  ;;  %v553_v12 = vmul.f32 0.01, %v537_v43  ;;  %v2637_v52 = vld [vmem:[#allocation7 + $0x180] sm:$0xff]  }
 0x1c2   : > { %vm546_vm5 = vcmp.ge.f32.partialorder %v538_v44, 0.0  ;;  %vm3357_vm9 = vcmp.eq.s32.totalorder %v688_v7, 7  ;;  %v558_v60 = vsel %vm542_vm12, %v534_v39, %v550_v56  ;;  %v559_v16 = vsel %vm543_vm13, %v535_v41, %v551_v61 }
 0x1c3   : > { %v783_v18 = vsel %vm3297_vm4, 0.0, %v3351_v63  ;;  %v554_v23 = vmul.f32 0.01, %v538_v44  ;;  %v776_v24 = vsel %vm3281_vm0, 0.0, %v558_v60  ;;  %v777_v55 = vsel %vm3285_vm1, 0.0, %v559_v16 }
 0x1c4   : > { %v808_v28 = vsel %vm3289_vm2, 0.0, %v558_v60  ;;  %v809_v7 = vsel %vm3293_vm3, 0.0, %v559_v16  ;;  %vm3372_vm11 = vcmp.eq.s32.totalorder %v695_v47, 0  ;;  %v816_v35 = vrot.slane %v776_v24, 7 }
 0x1c5   : > { %v817_v6 = vrot.slane %v777_v55, 7  ;;  %v3376_v36 = vrot.slane %v808_v28, 1  ;;  %v834_v38 = vrot.slane %v809_v7, 1  ;;  %v3378_v0 = vpack.c.bf16 %v559_v16, %v558_v60  ;;  %v2639_v16 = vld [vmem:[#allocation7 + $0x1c8] sm:$0xff]  }
 0x1c6   : > { %v3380_v25 = vrot.slane %v783_v18, 7  ;;  %v560_v2 = vsel %vm544_vm15, %v536_v42, %v552_v8  ;;  %v561_v3 = vsel %vm545_vm7, %v537_v43, %v553_v12  ;;  %vm3384_vm0 = vcmp.eq.s32.totalorder %v702_v50, 0 }
 0x1c7   : > { %vm3388_vm1 = vcmp.eq.s32.totalorder %v695_v47, 7  ;;  %vm3769_vm2 = vcmp.lt.s32.totalorder %v3260_v40, 1  ;;  %v810_v39 = vsel %vm3317_vm6, 0.0, %v560_v2  ;;  %vm3770_vm3 = vcmp.lt.s32.totalorder %v3260_v40, 7  ;;  %1086 = vmatprep.mubr.bf16.mxu1 %v3378_v0 }
 0x1c8   : > { %v831_v33 = vsel %vm3769_vm2, %v816_v35, %v817_v6  ;;  %v848_v41 = vsel %vm3770_vm3, %v3376_v36, %v834_v38  ;;  %v779_v42 = vsel %vm3322_vm8, 0.0, %v561_v3  ;;  %vm3771_vm4 = vmmov %vm3769_vm2  ;;  %v835_v43 = vrot.slane %v810_v39, 1  ;;  %v2641_v39 = vld [vmem:[#allocation7 + $0x208] sm:$0xff]  }
 0x1c9   : > { %v832_v47 = vsel %vm3771_vm4, %v3380_v25, %v816_v35  ;;  %vm3772_vm7 = vnez %v3754_v26  ;;  %v819_v20 = vrot.slane %v779_v42, 7  ;;  %vm3407_vm6 = vcmp.eq.s32.totalorder %v702_v50, 7  ;;  %vm3775_vm8 = vmmov %vm3770_vm3  ;;  %v2642_v35 = vld [vmem:[#allocation7 + $0x1d0] sm:$0xff]  }
 0x1ca   : > { %v811_v56 = vsel %vm3772_vm7, 0.0, %v561_v3  ;;  %v3411_v8 = vpack.c.bf16 %v831_v33, %v832_v47  ;;  %v3413_v12 = vpack.c.bf16 %v561_v3, %v560_v2  ;;  %v562_v60 = vsel %vm546_vm5, %v538_v44, %v554_v23  ;;  %vm3777_vm13 = vmmov %vm3770_vm3 }
 0x1cb   : > { %v836_v22 = vrot.slane %v811_v56, 1  ;;  %v847_v18 = vsel %vm3775_vm8, %v834_v38, %v835_v43  ;;  %vm3776_vm12 = vnez %v3756_v45  ;;  %v528_v50 = vmul.f32 %v3276_v57, %v3332_v31  ;;  %v2640_v31 = vld [vmem:[#allocation7 + $0x188] sm:$0xff]   ;;  %vm3778_vm15 = vmmov %vm3770_vm3  ;;  %v2645_v56 = vld [vmem:[#allocation7 + $0x1d8] sm:$0xff]  }
 0x1cc   : > { %v812_v26 = vsel %vm3776_vm12, 0.0, %v562_v60  ;;  %v539_v24 = vadd.f32 %v3279_v58, %v527_v34  ;;  %1087 = vmatmul.mubr.bf16.vlgmr.msra.gmra.mrb[0].mxu1 %v3411_v8  ;;  %v3424_v55 = vpack.c.bf16 %v847_v18, %v848_v41  ;;  %v778_v23 = vsel %vm3347_vm14, 0.0, %v560_v2 }
 0x1cd   : > { %v837_v28 = vrot.slane %v812_v26, 1  ;;  %v846_v44 = vsel %vm3777_vm13, %v835_v43, %v836_v22  ;;  %2309 = vmatpush3.bf16.msra.mxu1 %v2637_v52  ;;  %1094 = vmatprep.mubr.bf16.mxu1 %v3413_v12  ;;  %v540_v45 = vadd.f32 %v3279_v58, %v528_v50  ;;  %v818_v34 = vrot.slane %v778_v23, 7  ;;  %v2643_v43 = vld [vmem:[#allocation7 + $0x190] sm:$0xff]   ;;  %v2647_v23 = vld [vmem:[#allocation7 + $0x218] sm:$0xff]  }
 0x1ce   : > { %vm547_vm5 = vcmp.ge.f32.partialorder %v539_v24, 0.0  ;;  %v555_v57 = vmul.f32 0.01, %v539_v24  ;;  %2428 = vmatprep.mubr.bf16.mxu0 %v3424_v55  ;;  %2310 = vmatprep.subr.bf16.mxu1 %v2639_v16  ;;  %v815_v54 = vsel %vm3353_vm10, 0.0, %v3351_v63  ;;  %v780_v38 = vsel %vm3357_vm9, 0.0, %v562_v60  ;;  %vm3779_vm10 = vmmov %vm3769_vm2  ;;  %v2644_v26 = vld [vmem:[#allocation7 + $0x210] sm:$0xff]  }
 0x1cf   : > { %v845_v7 = vsel %vm3778_vm15, %v836_v22, %v837_v28  ;;  %v3444_v58 = vmul.f32 %v3307_v10, %v609_v49  ;;  %vm548_vm14 = vcmp.ge.f32.partialorder %v540_v45, 0.0  ;;  %v556_v3 = vmul.f32 0.01, %v540_v45  ;;  %vm3780_vm9 = vmmov %vm3769_vm2 }
 0x1d0   : > { %v3446_v2 = vpack.c.bf16 %v845_v7, %v846_v44  ;;  %v563_v33 = vsel %vm547_vm5, %v539_v24, %v555_v57  ;;  %v829_v13 = vsel %vm3779_vm10, %v818_v34, %v819_v20  ;;  %v830_v9 = vsel %vm3780_vm9, %v817_v6, %v818_v34  ;;  %vm3782_vm2 = vmmov %vm3770_vm3 }
 0x1d1   : > { %v813_v41 = vsel %vm3372_vm11, 0.0, %v563_v33  ;;  %v3454_v42 = vpack.c.bf16 %v563_v33, %v562_v60  ;;  %v564_v14 = vsel %vm548_vm14, %v540_v45, %v556_v3  ;;  %2311 = vmatpush3.bf16.msra.mxu1 %v2640_v31  ;;  %v3457_v47 = vpack.c.bf16 %v829_v13, %v830_v9  ;;  %vm3781_vm11 = vmmov %vm3770_vm3  ;;  %v2648_v45 = vld [vmem:[#allocation7 + $0x1e0] sm:$0xff]   ;;  %v2665_v13 = vld [vmem:[#allocation7 + $0x148] sm:$0xff]  }
 0x1d2   : > { %2429 = vmatmul.mubr.bf16.vlgmr.msra.gmra.mrb[16].mxu0 %v3446_v2  ;;  %v838_v49 = vrot.slane %v813_v41, 1  ;;  %v840_v52 = vrot.slane %v815_v54, 1  ;;  %v814_v32 = vsel %vm3384_vm0, 0.0, %v564_v14  ;;  %2312 = vmatprep.subr.bf16.mxu1 %v2642_v35  ;;  %v781_v6 = vsel %vm3388_vm1, 0.0, %v563_v33  ;;  %vm3783_vm0 = vmmov %vm3771_vm4  ;;  %v2649_v54 = vld [vmem:[#allocation7 + $0x1a0] sm:$0xff]   ;;  %v2663_v33 = vld [vmem:[#allocation7 + $0x108] sm:$0xff]  }
 0x1d3   : > { %2437 = vmatpush3.bf16.msra.mxu0 %v3137_v46  ;;  %v820_v22 = vrot.slane %v780_v38, 7  ;;  %v3465_v60 = vpack.c.bf16 %v3351_v63, %v564_v14  ;;  %v839_v16 = vrot.slane %v814_v32, 1  ;;  %v821_v4 = vrot.slane %v781_v6, 7  ;;  %vm3784_vm1 = vmmov %vm3782_vm2  ;;  %v2659_v38 = vld [vmem:[#allocation7 + $0x238] sm:$0xff]   ;;  %v2661_v3 = vld [vmem:[#allocation7 + $0xc0] sm:$0xff]  }
 0x1d4   : > { %v844_v18 = vsel %vm3781_vm11, %v837_v28, %v838_v49  ;;  %2438 = vmatprep.subr.bf16.mxu0 %v2641_v39  ;;  %v849_v46 = vsel %vm3782_vm2, %v840_v52, %v3376_v36  ;;  %1095 = vmatmul.mubr.bf16.gmra.mrb[4].mxu1 %v3457_v47  ;;  %v782_v63 = vsel %vm3407_vm6, 0.0, %v564_v14  ;;  %v3481_v50 = vmul.f32 %v3307_v10, %v610_v59  ;;  %vm3785_vm3 = vmmov %vm3784_vm1  ;;  %v2646_v28 = vld [vmem:[#allocation7 + $0x198] sm:$0xff]   ;;  %v2664_v41 = vld [vmem:[#allocation7 + $0xc8] sm:$0xff]  }
 0x1d5   : > { %v828_v29 = vsel %vm3783_vm0, %v819_v20, %v820_v22  ;;  %v843_v24 = vsel %vm3784_vm1, %v838_v49, %v839_v16  ;;  %2313 = vmatpush3.bf16.msra.mxu1 %v2643_v43  ;;  %1102 = vmatprep.mubr.bf16.mxu1 %v3454_v42  ;;  %v842_v36 = vsel %vm3785_vm3, %v839_v16, %v840_v52  ;;  %vm3786_vm4 = vmmov %vm3783_vm0  ;;  %v822_v61 = vrot.slane %v782_v63, 7  ;;  %v2666_v9 = vld [vmem:[#allocation7 + $0x110] sm:$0xff]   ;;  %v2669_v49 = vld [vmem:[#allocation7 + $0x118] sm:$0xff]  }
 0x1d6   : > { %v827_v20 = vsel %vm3786_vm4, %v820_v22, %v821_v4  ;;  %v3490_v44 = vpack.c.bf16 %v843_v24, %v844_v18  ;;  %v3492_v21 = vpack.c.bf16 %v849_v46, %v842_v36  ;;  %2314 = vmatprep.subr.bf16.mxu1 %v2645_v56  ;;  %vm3787_vm7 = vmmov %vm3783_vm0  ;;  %v3508_v7 = vmul.f32 %v3307_v10, %v605_v1  ;;  %v2650_v1 = vld [vmem:[#allocation7 + $0x220] sm:$0xff]   ;;  %v2667_v14 = vld [vmem:[#allocation7 + $0xd0] sm:$0xff]  }
 0x1d7   : > { %2439 = vmatpush3.bf16.msra.mxu0 %v2641_v39  ;;  %v3494_v59 = vpack.c.bf16 %v827_v20, %v828_v29  ;;  %v825_v57 = vsel %vm3787_vm7, %v822_v61, %v3380_v25  ;;  %vm3788_vm6 = vmmov %vm3783_vm0  ;;  %v3514_v35 = vmul.f32 %v3307_v10, %v606_v11  ;;  %v3520_v25 = vmul.f32 %v3307_v10, %v607_v17  ;;  %v2654_v11 = vld [vmem:[#allocation7 + $0x1f0] sm:$0xff]   ;;  %v2657_v17 = vld [vmem:[#allocation7 + $0x1f8] sm:$0xff]  }
 0x1d8   : > { %2440 = vmatprep.subr.bf16.mxu0 %v2644_v26  ;;  %v826_v31 = vsel %vm3788_vm6, %v821_v4, %v822_v61  ;;  %2432 = vmatprep.mubr.bf16.mxu0 %v3490_v44  ;;  %v3527_v48 = vmul.f32 %v3307_v10, %v608_v27  ;;  %v3533_v53 = vmul.f32 %v3307_v10, %v611_v37  ;;  %v2656_v27 = vld [vmem:[#allocation7 + $0x230] sm:$0xff]   ;;  %v2658_v37 = vld [vmem:[#allocation7 + $0x1b8] sm:$0xff]   ;;  %v2660_v10 = vld [vmem:[#allocation7 + $0x100] sm:$0xff]  }
 0x1d9   : > { %v3502_v34 = vpack.c.bf16 %v825_v57, %v826_v31  ;;  %2315 = vmatpush3.bf16.msra.mxu1 %v2646_v28  ;;  %v3540_v39 = vld [vmem:[#allocation7 + $0x140] sm:$0xff]   ;;  %v2668_v43 = vld [vmem:[#allocation7 + $0x150] sm:$0xff]   ;;  %v2670_v52 = vld [vmem:[#allocation7 + $0xd8] sm:$0xff]  }
 0x1da   : > { %2433 = vmatmul.mubr.bf16.gmra.mrb[20].mxu0 %v3492_v21  ;;  %2316 = vmatprep.subr.bf16.mxu1 %v2648_v45  ;;  %v2671_v32 = vld [vmem:[#allocation7 + $0x158] sm:$0xff]   ;;  %v2672_v56 = vld [vmem:[#allocation7 + $0x120] sm:$0xff]   ;;  %v2675_v22 = vld [vmem:[#allocation7 + $0x128] sm:$0xff]  }
 0x1db   : > { %2441 = vmatpush3.bf16.msra.mxu0 %v2644_v26  ;;  %2452 = vmatprep.mubr.bf16.mxu0 %v3424_v55  ;;  %v2673_v6 = vld [vmem:[#allocation7 + $0xe0] sm:$0xff]   ;;  %v2676_v18 = vld [vmem:[#allocation7 + $0xe8] sm:$0xff]   ;;  %v2678_v26 = vld [vmem:[#allocation7 + $0x130] sm:$0xff]  }
 0x1dc   : > { %2442 = vmatprep.subr.bf16.mxu0 %v2647_v23  ;;  %1103 = vmatmul.mubr.bf16.gmra.mrb[8].mxu1 %v3494_v59  ;;  %v2674_v16 = vld [vmem:[#allocation7 + $0x160] sm:$0xff]   ;;  %v2677_v46 = vld [vmem:[#allocation7 + $0x168] sm:$0xff]   ;;  %v2679_v4 = vld [vmem:[#allocation7 + $0xf0] sm:$0xff]  }
 0x1dd   : > { %2317 = vmatpush3.bf16.msra.mxu1 %v2649_v54  ;;  %1110 = vmatprep.mubr.bf16.mxu1 %v3465_v60  ;;  %v2680_v29 = vld [vmem:[#allocation7 + $0x170] sm:$0xff]   ;;  %v2682_v63 = vld [vmem:[#allocation7 + $0xf8] sm:$0xff]  }
 0x1de   : > { %2318 = vmatprep.subr.bf16.mxu1 %v2651_v62  ;;  %v2683_v24 = vld [vmem:[#allocation7 + $0x178] sm:$0xff]  }
 0x1df   : > { %2443 = vmatpush3.bf16.msra.mxu0 %v2647_v23 }
 0x1e0   : > { %2444 = vmatprep.subr.bf16.mxu0 %v2650_v1 }
 0x1e1   : > { %2319 = vmatpush3.bf16.msra.mxu1 %v2652_v5 }
 0x1e2   : > { %2320 = vmatprep.subr.bf16.mxu1 %v2654_v11 }
 0x1e3   : > { %2445 = vmatpush3.bf16.msra.mxu0 %v2650_v1 }
 0x1e4   : > { %2446 = vmatprep.subr.bf16.mxu0 %v2653_v30  ;;  %1111 = vmatmul.mubr.bf16.gmra.mrb[12].mxu1 %v3502_v34 }
 0x1e5   : > { %2321 = vmatpush3.bf16.msra.mxu1 %v2655_v15  ;;  %1456 = vmatprep.mubr.bf16.mxu1 %v3378_v0 }
 0x1e6   : > { %2322 = vmatprep.subr.bf16.mxu1 %v2657_v17 }
 0x1e7   : > { %2447 = vmatpush3.bf16.msra.mxu0 %v2653_v30 }
 0x1e8   : > { %2448 = vmatprep.subr.bf16.mxu0 %v2656_v27 }
 0x1e9   : > { %2323 = vmatpush3.bf16.msra.mxu1 %v2658_v37 }
 0x1ea   : > { %2360 = vmatprep.subr.bf16.mxu1 %v2660_v10 }
 0x1eb   : > { %2449 = vmatpush3.bf16.msra.mxu0 %v2656_v27 }
 0x1ec   : > { %2450 = vmatprep.subr.bf16.mxu0 %v2659_v38  ;;  %1457 = vmatmul.mubr.bf16.vlgmr.msra.gmra.mrb[16].mxu1 %v3411_v8 }
 0x1ed   : > { %2361 = vmatpush3.bf16.msra.mxu1 %v2661_v3  ;;  %1463 = vmatprep.mubr.bf16.mxu1 %v3413_v12 }
 0x1ee   : > { %2362 = vmatprep.subr.bf16.mxu1 %v2663_v33 }
 0x1ef   : > { %2451 = vmatpush3.bf16.msra.mxu0 %v2659_v38 }
 0x1f0   : > { %2460 = vmatprep.subr.bf16.mxu0 %v3540_v39 }
 0x1f1   : > { %2363 = vmatpush3.bf16.msra.mxu1 %v2664_v41 }
 0x1f2   : > { %2453 = vmatmul.mubr.bf16.vlgmr.msra.gmra.mrb[24].mxu0 %v3446_v2  ;;  %2364 = vmatprep.subr.bf16.mxu1 %v2666_v9 }
 0x1f3   : > { %2456 = vmatprep.mubr.bf16.mxu0 %v3490_v44  ;;  %2461 = vmatpush3.bf16.msra.mxu0 %v3540_v39 }
 0x1f4   : > { %2462 = vmatprep.subr.bf16.mxu0 %v2665_v13  ;;  %1464 = vmatmul.mubr.bf16.gmra.mrb[20].mxu1 %v3457_v47 }
 0x1f5   : > { %2365 = vmatpush3.bf16.msra.mxu1 %v2667_v14  ;;  %1471 = vmatprep.mubr.bf16.mxu1 %v3454_v42 }
 0x1f6   : > { %2366 = vmatprep.subr.bf16.mxu1 %v2669_v49 }
 0x1f7   : > { %2463 = vmatpush3.bf16.msra.mxu0 %v2665_v13 }
 0x1f8   : > { %2464 = vmatprep.subr.bf16.mxu0 %v2668_v43 }
 0x1f9   : > { %2367 = vmatpush3.bf16.msra.mxu1 %v2670_v52 }
 0x1fa   : > { %2457 = vmatmul.mubr.bf16.gmra.mrb[28].mxu0 %v3492_v21  ;;  %2368 = vmatprep.subr.bf16.mxu1 %v2672_v56 }
 0x1fb   : > { %2465 = vmatpush3.bf16.msra.mxu0 %v2668_v43  ;;  %2476 = vmatprep.mubr.bf16.mxu0 %v3424_v55  ;;  %v2681_v55 = vld [vmem:[#allocation7 + $0x138] sm:$0xff]  }
 0x1fc   : > { %2466 = vmatprep.subr.bf16.mxu0 %v2671_v32  ;;  %1472 = vmatmul.mubr.bf16.gmra.mrb[24].mxu1 %v3494_v59 }
 0x1fd   : > { %2369 = vmatpush3.bf16.msra.mxu1 %v2673_v6  ;;  %1479 = vmatprep.mubr.bf16.mxu1 %v3465_v60 }
 0x1fe   : > { %2370 = vmatprep.subr.bf16.mxu1 %v2675_v22 }
 0x1ff   : > { %2467 = vmatpush3.bf16.msra.mxu0 %v2671_v32 }
 0x200   : > { %2468 = vmatprep.subr.bf16.mxu0 %v2674_v16 }
 0x201   : > { %2371 = vmatpush3.bf16.msra.mxu1 %v2676_v18 }
 0x202   : > { %2372 = vmatprep.subr.bf16.mxu1 %v2678_v26 }
 0x203   : > { %2469 = vmatpush3.bf16.msra.mxu0 %v2674_v16 }
 0x204   : > { %2470 = vmatprep.subr.bf16.mxu0 %v2677_v46  ;;  %1480 = vmatmul.mubr.bf16.gmra.mrb[28].mxu1 %v3502_v34 }
 0x205   : > { %2373 = vmatpush3.bf16.msra.mxu1 %v2679_v4  ;;  %1728 = vmatprep.mubr.bf16.mxu1 %v3378_v0 }
 0x206   : > { %2374 = vmatprep.subr.bf16.mxu1 %v2681_v55 }
 0x207   : > { %2471 = vmatpush3.bf16.msra.mxu0 %v2677_v46 }
 0x208   : > { %2472 = vmatprep.subr.bf16.mxu0 %v2680_v29 }
 0x209   : > { %2375 = vmatpush3.bf16.msra.mxu1 %v2682_v63 }
 0x20a   : > { %2484 = vmatprep.subr.bf16.mxu1 %v3540_v39 }
 0x20b   : > { %2473 = vmatpush3.bf16.msra.mxu0 %v2680_v29 }
 0x20c   : > { %2474 = vmatprep.subr.bf16.mxu0 %v2683_v24  ;;  %1729 = vmatmul.mubr.bf16.vlgmr.msra.gmra.mrb[32].mxu1 %v3411_v8 }
 0x20d   : > { %2492 = vmatpush3.bf16.msra.mxu1 %v3540_v39  ;;  %1736 = vmatprep.mubr.bf16.mxu1 %v3413_v12 }
 0x20e   : > { %2485 = vmatprep.subr.bf16.mxu1 %v2665_v13 }
 0x20f   : > { %2475 = vmatpush3.bf16.msra.mxu0 %v2683_v24 }
 0x211   : > { %2493 = vmatpush3.bf16.msra.mxu1 %v2665_v13 }
 0x212   : > { %2477 = vmatmul.mubr.bf16.vlgmr.msra.gmra.mrb[32].mxu0 %v3446_v2  ;;  %2486 = vmatprep.subr.bf16.mxu1 %v2668_v43 }
 0x214   : > { %1737 = vmatmul.mubr.bf16.gmra.mrb[36].mxu1 %v3457_v47 }
 0x215   : > { %2494 = vmatpush3.bf16.msra.mxu1 %v2668_v43  ;;  %1744 = vmatprep.mubr.bf16.mxu1 %v3454_v42 }
 0x216   : > { %2487 = vmatprep.subr.bf16.mxu1 %v2671_v32 }
 0x219   : > { %2495 = vmatpush3.bf16.msra.mxu1 %v2671_v32 }
 0x21a   : > { %2488 = vmatprep.subr.bf16.mxu1 %v2674_v16 }
 0x21c   : > { %1745 = vmatmul.mubr.bf16.gmra.mrb[40].mxu1 %v3494_v59 }
 0x21d   : > { %2496 = vmatpush3.bf16.msra.mxu1 %v2674_v16  ;;  %1752 = vmatprep.mubr.bf16.mxu1 %v3465_v60 }
 0x21e   : > { %2489 = vmatprep.subr.bf16.mxu1 %v2677_v46 }
 0x221   : > { %2497 = vmatpush3.bf16.msra.mxu1 %v2677_v46 }
 0x222   : > { %2490 = vmatprep.subr.bf16.mxu1 %v2680_v29 }
 0x224   : > { %1753 = vmatmul.mubr.bf16.gmra.mrb[44].mxu1 %v3502_v34 }
 0x225   : > { %2498 = vmatpush3.bf16.msra.mxu1 %v2680_v29  ;;  %2480 = vmatprep.mubr.bf16.mxu1 %v3490_v44 }
 0x226   : > { %2491 = vmatprep.subr.bf16.mxu1 %v2683_v24 }
 0x229   : > { %2499 = vmatpush3.bf16.msra.mxu1 %v2683_v24 }
 0x22c   : > { %2481 = vmatmul.mubr.bf16.vlgmr.msra.gmra.mrb[48].mxu1 %v3492_v21 }
 0x29f   : > { %v2272_v0 = vpop.f32.mrb[0].mxu1 }
 0x2a0   : > { %v2273_v8 = vpop.f32.mrb[1].mxu1 }
 0x2a1   : > { %v2274_v12 = vadd.f32 %v2273_v8, %v2272_v0  ;;  %v2275_v2 = vpop.f32.mrb[2].mxu1 }
 0x2a2   : > { %v2276_v42 = vpop.f32.mrb[3].mxu1 }
 0x2a3   : > { %v2277_v47 = vadd.f32 %v2276_v42, %v2275_v2 }
 0x2a5   : > { %v2430_v36 = vpop.f32.mrb[16].mxu0 }
 0x2a6   : > { %v1152_v60 = vpop.f32.mrb[17].mxu0 }
 0x2a7   : > { %v3568_v28 = vadd.f32 %v2274_v12, %v1152_v60  ;;  %v2431_v20 = vpop.f32.mrb[18].mxu0  ;;  %v2278_v59 = vpop.f32.mrb[4].mxu1 }
 0x2a8   : > { %v1155_v61 = vpop.f32.mrb[19].mxu0  ;;  %v2279_v44 = vpop.f32.mrb[5].mxu1 }
 0x2a9   : > { %v3570_v23 = vadd.f32 %v2277_v47, %v1155_v61  ;;  %v2280_v45 = vadd.f32 %v2279_v44, %v2278_v59  ;;  %v2281_v57 = vpop.f32.mrb[6].mxu1 }
 0x2aa   : > { %v2282_v31 = vpop.f32.mrb[7].mxu1 }
 0x2ab   : > { %v3572_v21 = vadd.f32 %v2430_v36, %v2280_v45  ;;  %v2283_v34 = vadd.f32 %v2282_v31, %v2281_v57 }
 0x2ad   : > { %v2434_v54 = vpop.f32.mrb[20].mxu0  ;;  %v3574_v1 = vadd.f32 %v2431_v20, %v2283_v34 }
 0x2ae   : > { %v1168_v62 = vpop.f32.mrb[21].mxu0 }
 0x2af   : > { %v2435_v5 = vpop.f32.mrb[22].mxu0  ;;  %v2284_v30 = vpop.f32.mrb[8].mxu1 }
 0x2b0   : > { %v1171_v11 = vpop.f32.mrb[23].mxu0  ;;  %v2285_v15 = vpop.f32.mrb[9].mxu1 }
 0x2b1   : > { %v2286_v17 = vadd.f32 %v2285_v15, %v2284_v30  ;;  %v2287_v27 = vpop.f32.mrb[10].mxu1 }
 0x2b2   : > { %v2288_v37 = vpop.f32.mrb[11].mxu1 }
 0x2b3   : > { %v3576_v10 = vadd.f32 %v2286_v17, %v1168_v62  ;;  %v2289_v38 = vadd.f32 %v2288_v37, %v2287_v27 }
 0x2b5   : > { %v3578_v3 = vadd.f32 %v2289_v38, %v1171_v11 }
 0x2b7   : > { %v2290_v33 = vpop.f32.mrb[12].mxu1 }
 0x2b8   : > { %v2291_v39 = vpop.f32.mrb[13].mxu1 }
 0x2b9   : > { %v2292_v41 = vadd.f32 %v2291_v39, %v2290_v33  ;;  %v2293_v13 = vpop.f32.mrb[14].mxu1 }
 0x2ba   : > { %v2294_v9 = vpop.f32.mrb[15].mxu1 }
 0x2bb   : > { %v3580_v14 = vadd.f32 %v2434_v54, %v2292_v41 }
 0x2bf   : > { %v2324_v49 = vpop.f32.mrb[16].mxu1 }
 0x2c0   : > { %v2325_v43 = vpop.f32.mrb[17].mxu1 }
 0x2c1   : > { %v2327_v52 = vpop.f32.mrb[18].mxu1 }
 0x2c2   : > { %v2328_v32 = vpop.f32.mrb[19].mxu1 }
 0x2c3   : > { %v2329_v56 = vadd.f32 %v2328_v32, %v2327_v52 }
 0x2c5   : > { %v2454_v6 = vpop.f32.mrb[24].mxu0 }
 0x2c6   : > { %v1522_v22 = vpop.f32.mrb[25].mxu0 }
 0x2c7   : > { %v2455_v16 = vpop.f32.mrb[26].mxu0  ;;  %v2330_v26 = vpop.f32.mrb[20].mxu1 }
 0x2c8   : > { %v1524_v18 = vpop.f32.mrb[27].mxu0  ;;  %v2331_v4 = vpop.f32.mrb[21].mxu1 }
 0x2c9   : > { %v1525_v46 = vadd.f32 %v2329_v56, %v1524_v18  ;;  %v2332_v55 = vadd.f32 %v2331_v4, %v2330_v26  ;;  %v2333_v29 = vpop.f32.mrb[22].mxu1 }
 0x2ca   : > { %v2334_v63 = vpop.f32.mrb[23].mxu1 }
 0x2cb   : > { %v1530_v24 = vadd.f32 %v2454_v6, %v2332_v55  ;;  %v2335_v0 = vadd.f32 %v2334_v63, %v2333_v29 }
 0x2cd   : > { %v2458_v8 = vpop.f32.mrb[28].mxu0  ;;  %v1533_v2 = vadd.f32 %v2455_v16, %v2335_v0 }
 0x2ce   : > { %v1537_v12 = vpop.f32.mrb[29].mxu0 }
 0x2cf   : > { %v2459_v42 = vpop.f32.mrb[30].mxu0  ;;  %v2336_v36 = vpop.f32.mrb[24].mxu1 }
 0x2d0   : > { %v1540_v47 = vpop.f32.mrb[31].mxu0  ;;  %v2337_v60 = vpop.f32.mrb[25].mxu1 }
 0x2d1   : > { %v2338_v20 = vadd.f32 %v2337_v60, %v2336_v36  ;;  %v2339_v61 = vpop.f32.mrb[26].mxu1 }
 0x2d2   : > { %v2340_v59 = vpop.f32.mrb[27].mxu1 }
 0x2d3   : > { %v1538_v44 = vadd.f32 %v2338_v20, %v1537_v12  ;;  %v2341_v45 = vadd.f32 %v2340_v59, %v2339_v61 }
 0x2d5   : > { %v3582_v57 = vadd.f32 %v2341_v45, %v1540_v47 }
 0x2d7   : > { %v2342_v31 = vpop.f32.mrb[28].mxu1 }
 0x2d8   : > { %v2343_v34 = vpop.f32.mrb[29].mxu1 }
 0x2d9   : > { %v2344_v54 = vadd.f32 %v2343_v34, %v2342_v31  ;;  %v2345_v62 = vpop.f32.mrb[30].mxu1 }
 0x2da   : > { %v2346_v5 = vpop.f32.mrb[31].mxu1 }
 0x2db   : > { %v3584_v11 = vadd.f32 %v2458_v8, %v2344_v54  ;;  %v2347_v30 = vadd.f32 %v2346_v5, %v2345_v62 }
 0x2dd   : > { %v1549_v15 = vadd.f32 %v2459_v42, %v2347_v30 }
 0x2df   : > { %v2376_v17 = vpop.f32.mrb[32].mxu1 }
 0x2e0   : > { %v2377_v27 = vpop.f32.mrb[33].mxu1 }
 0x2e1   : > { %v2378_v37 = vadd.f32 %v2377_v27, %v2376_v17  ;;  %v2379_v38 = vpop.f32.mrb[34].mxu1 }
 0x2e2   : > { %v2380_v33 = vpop.f32.mrb[35].mxu1 }
 0x2e3   : > { %v2381_v39 = vadd.f32 %v2380_v33, %v2379_v38 }
 0x2e5   : > { %v2478_v41 = vpop.f32.mrb[32].mxu0  ;;  %v1734_v9 = vadd.f32 %v2381_v39, %v3568_v28 }
 0x2e6   : > { %v1795_v13 = vpop.f32.mrb[33].mxu0 }
 0x2e7   : > { %v1796_v49 = vadd.f32 %v2378_v37, %v1795_v13  ;;  %v2479_v43 = vpop.f32.mrb[34].mxu0  ;;  %v2382_v32 = vpop.f32.mrb[36].mxu1 }
 0x2e8   : > { %v1798_v52 = vpop.f32.mrb[35].mxu0  ;;  %v2383_v22 = vpop.f32.mrb[37].mxu1 }
 0x2e9   : > { %v3587_v56 = vadd.f32 %v1796_v49, %v1525_v46  ;;  %v1799_v6 = vadd.f32 %v1798_v52, %v1734_v9  ;;  %v2384_v16 = vadd.f32 %v2383_v22, %v2382_v32  ;;  %v2385_v18 = vpop.f32.mrb[38].mxu1 }
 0x2ea   : > { %v2386_v4 = vpop.f32.mrb[39].mxu1 }
 0x2eb   : > { %v3589_v26 = vadd.f32 %v1799_v6, %v1530_v24  ;;  %v1739_v55 = vadd.f32 %v2384_v16, %v3570_v23  ;;  %v2387_v29 = vadd.f32 %v2386_v4, %v2385_v18  ;;  %v1848_v63 = vmul.f32 %v3587_v56, %v3587_v56 }
 0x2ed   : > { %v1834_v28 = vadd.f32 %v3589_v26, %v3587_v56  ;;  %v1849_v46 = vmul.f32 %v3589_v26, %v3589_v26  ;;  %v1804_v0 = vadd.f32 %v2478_v41, %v1739_v55  ;;  %v1742_v8 = vadd.f32 %v2387_v29, %v3572_v21 }
 0x2ef   : > { %v1856_v12 = vadd.f32 %v1849_v46, %v1848_v63  ;;  %v3599_v42 = vadd.f32 %v1804_v0, %v1533_v2  ;;  %v1807_v24 = vadd.f32 %v2479_v43, %v1742_v8  ;;  %v2388_v47 = vpop.f32.mrb[40].mxu1 }
 0x2f0   : > { %v2389_v36 = vpop.f32.mrb[41].mxu1 }
 0x2f1   : > { %v1850_v23 = vmul.f32 %v3599_v42, %v3599_v42  ;;  %v3603_v60 = vadd.f32 %v1807_v24, %v1538_v44  ;;  %v2390_v20 = vadd.f32 %v2389_v36, %v2388_v47  ;;  %v2391_v61 = vpop.f32.mrb[42].mxu1  ;;  %v1835_v59 = vadd.f32 %v1834_v28, %v3599_v42 }
 0x2f2   : > { %v2392_v45 = vpop.f32.mrb[43].mxu1 }
 0x2f3   : > { %v1851_v31 = vmul.f32 %v3603_v60, %v3603_v60  ;;  %v2393_v21 = vadd.f32 %v2392_v45, %v2391_v61  ;;  %v1747_v2 = vadd.f32 %v2390_v20, %v3574_v1  ;;  %v1836_v34 = vadd.f32 %v1835_v59, %v3603_v60 }
 0x2f4   : > { %v1857_v54 = vadd.f32 %v1856_v12, %v1850_v23 }
 0x2f5   : > { %v1750_v62 = vadd.f32 %v2393_v21, %v3576_v10 }
 0x2f6   : > { %v1858_v5 = vadd.f32 %v1857_v54, %v1851_v31 }
 0x2f7   : > { %v2394_v30 = vpop.f32.mrb[44].mxu1 }
 0x2f8   : > { %v2395_v44 = vpop.f32.mrb[45].mxu1 }
 0x2f9   : > { %v2396_v17 = vadd.f32 %v2395_v44, %v2394_v30  ;;  %v2397_v27 = vpop.f32.mrb[46].mxu1 }
 0x2fa   : > { %v2398_v37 = vpop.f32.mrb[47].mxu1 }
 0x2fb   : > { %v2399_v38 = vadd.f32 %v2398_v37, %v2397_v27  ;;  %v1755_v33 = vadd.f32 %v2396_v17, %v3578_v3 }
 0x2fd   : > { %v1758_v39 = vadd.f32 %v2399_v38, %v3580_v14  ;;  %v625_v38 = vsub.s32 4, %v3260_v40 }
 0x2ff   : > { %v2482_v41 = vpop.f32.mrb[48].mxu1 }
 0x300   : > { %v1820_v13 = vadd.f32 %v2482_v41, %v1755_v33  ;;  %v1811_v9 = vpop.f32.mrb[49].mxu1  ;;  %v626_v41 = vrot.slane %v3270_v51, %v625_v38 }
 0x301   : > { %v1812_v1 = vadd.f32 %v1811_v9, %v1747_v2  ;;  %v2483_v49 = vpop.f32.mrb[50].mxu1  ;;  %v1893_v9 = vsub.s32 2, %v3260_v40 }
 0x302   : > { %v3613_v43 = vadd.f32 %v1820_v13, %v1549_v15  ;;  %v3615_v52 = vadd.f32 %v2483_v49, %v1758_v39  ;;  %v1814_v10 = vpop.f32.mrb[51].mxu1  ;;  %v637_v13 = vsub.s32 5, %v3260_v40  ;;  %v628_v49 = vmul.f32 %v626_v41, %v3514_v35 }
 0x303   : > { %v3618_v32 = vadd.f32 %v1812_v1, %v3582_v57  ;;  %v1815_v6 = vadd.f32 %v1814_v10, %v1750_v62  ;;  %v627_v1 = vmul.f32 %v626_v41, %v3508_v7  ;;  %v630_v10 = vmul.f32 %v626_v41, %v3527_v48 }
 0x304   : > { %v1854_v4 = vmul.f32 %v3613_v43, %v3613_v43  ;;  %v1855_v29 = vmul.f32 %v3615_v52, %v3615_v52 }
 0x305   : > { %v1837_v22 = vadd.f32 %v1836_v34, %v3618_v32  ;;  %v1852_v3 = vmul.f32 %v3618_v32, %v3618_v32  ;;  %v3624_v14 = vadd.f32 %v1815_v6, %v3584_v11 }
 0x307   : > { %v1859_v16 = vadd.f32 %v1858_v5, %v1852_v3  ;;  %v1838_v18 = vadd.f32 %v1837_v22, %v3624_v14  ;;  %v1853_v15 = vmul.f32 %v3624_v14, %v3624_v14 }
 0x309   : > { %v1839_v57 = vadd.f32 %v1838_v18, %v3613_v43  ;;  %v1860_v55 = vadd.f32 %v1859_v16, %v1853_v15 }
 0x30b   : > { %v1840_v63 = vadd.f32 %v1839_v57, %v3615_v52  ;;  %v1861_v28 = vadd.f32 %v1860_v55, %v1854_v4 }
 0x30d   : > { %v1841_v11 = vrot.slane %v1840_v63, 4  ;;  %v1862_v46 = vadd.f32 %v1861_v28, %v1855_v29 }
 0x30f   : > { %v1842_v0 = vadd.f32 %v1841_v11, %v1840_v63  ;;  %v1863_v8 = vrot.slane %v1862_v46, 4 }
 0x311   : > { %v1843_v12 = vrot.slane %v1842_v0, 2  ;;  %v1864_v24 = vadd.f32 %v1863_v8, %v1862_v46 }
 0x313   : > { %v1844_v47 = vadd.f32 %v1843_v12, %v1842_v0  ;;  %v1865_v36 = vrot.slane %v1864_v24, 2 }
 0x315   : > { %v1845_v23 = vrot.slane %v1844_v47, 1  ;;  %v1866_v20 = vadd.f32 %v1865_v36, %v1864_v24 }
 0x317   : > { %v1846_v61 = vadd.f32 %v1845_v23, %v1844_v47  ;;  %v1867_v59 = vrot.slane %v1866_v20, 1 }
 0x319   : > { %v1847_v45 = vmul.f32 0.015625, %v1846_v61  ;;  %v1868_v31 = vadd.f32 %v1867_v59, %v1866_v20 }
 0x31b   : > { %v1869_v21 = vmul.f32 0.015625, %v1868_v31  ;;  %v1870_v2 = vmul.f32 %v1847_v45, %v1847_v45  ;;  %v1877_v34 = vsub.f32 %v3618_v32, %v1847_v45  ;;  %v1878_v54 = vsub.f32 %v3624_v14, %v1847_v45 }
 0x31c   : > { %v1873_v62 = vsub.f32 %v3587_v56, %v1847_v45  ;;  %v1874_v5 = vsub.f32 %v3589_v26, %v1847_v45  ;;  %v1875_v30 = vsub.f32 %v3599_v42, %v1847_v45  ;;  %v1876_v44 = vsub.f32 %v3603_v60, %v1847_v45 }
 0x31d   : > { %v1871_v17 = vsub.f32 %v1869_v21, %v1870_v2  ;;  %v1879_v27 = vsub.f32 %v3613_v43, %v1847_v45  ;;  %v1880_v37 = vsub.f32 %v3615_v52, %v1847_v45  ;;  %v634_v56 = vmul.f32 %v626_v41, %v3310_v19 }
 0x31e   : > { %v638_v26 = vrot.slane %v3270_v51, %v637_v13  ;;  %v631_v42 = vmul.f32 %v626_v41, %v3444_v58  ;;  %v632_v60 = vmul.f32 %v626_v41, %v3481_v50  ;;  %v1905_v43 = vsub.s32 3, %v3260_v40 }
 0x31f   : > { %v1872_v33 = vmax.f32 %v1871_v17, 0.0  ;;  %v629_v52 = vmul.f32 %v626_v41, %v3520_v25  ;;  %v633_v19 = vmul.f32 %v626_v41, %v3533_v53  ;;  %v1894_v58 = vrot.slane %v3270_v51, %v1893_v9 }
 0x320   : > { %v646_v32 = vadd.f32 %v638_v26, %v634_v56  ;;  %v643_v6 = vadd.f32 %v638_v26, %v631_v42  ;;  %v644_v22 = vadd.f32 %v638_v26, %v632_v60  ;;  %v639_v50 = vadd.f32 %v638_v26, %v627_v1 }
 0x321   : > { %v1881_v39 = vadd.f32 1e-05, %v1872_v33  ;;  %v640_v3 = vadd.f32 %v638_v26, %v628_v49  ;;  %v1906_v7 = vrot.slane %v3270_v51, %v1905_v43  ;;  %v641_v16 = vadd.f32 %v638_v26, %v629_v52 }
 0x322   : > { %v642_v35 = vadd.f32 %v638_v26, %v630_v10  ;;  %v645_v18 = vadd.f32 %v638_v26, %v633_v19 }
 0x323   : > { %2688 = vrsqrt.f32 %v1881_v39 }
 0x32d   : > { %v2689_v14 = vpop.eup %2688 }
 0x32e   : > { %v1887_v40 = vmul.f32 %v2689_v14, %v1877_v34  ;;  %v1888_v15 = vmul.f32 %v2689_v14, %v1878_v54  ;;  %v1883_v25 = vmul.f32 %v2689_v14, %v1873_v62  ;;  %v1884_v4 = vmul.f32 %v2689_v14, %v1874_v5 }
 0x32f   : > { %v1885_v48 = vmul.f32 %v2689_v14, %v1875_v30  ;;  %v1886_v57 = vmul.f32 %v2689_v14, %v1876_v44  ;;  %v1889_v53 = vmul.f32 %v2689_v14, %v1879_v27  ;;  %v1890_v55 = vmul.f32 %v2689_v14, %v1880_v37 }
 0x330   : > { %v1899_v29 = vmul.f32 %v1894_v58, %v1887_v40  ;;  %v1900_v63 = vmul.f32 %v1894_v58, %v1888_v15  ;;  %v1895_v28 = vmul.f32 %v1894_v58, %v1883_v25  ;;  %v1896_v11 = vmul.f32 %v1894_v58, %v1884_v4 }
 0x331   : > { %v1897_v46 = vmul.f32 %v1894_v58, %v1885_v48  ;;  %v1898_v0 = vmul.f32 %v1894_v58, %v1886_v57  ;;  %v1901_v8 = vmul.f32 %v1894_v58, %v1889_v53  ;;  %v1902_v12 = vmul.f32 %v1894_v58, %v1890_v55 }
 0x332   : > { %v1911_v51 = vadd.f32 %v1906_v7, %v1899_v29  ;;  %v1912_v24 = vadd.f32 %v1906_v7, %v1900_v63  ;;  %v1907_v47 = vadd.f32 %v1906_v7, %v1895_v28  ;;  %v1908_v36 = vadd.f32 %v1906_v7, %v1896_v11 }
 0x333   : > { %v1909_v23 = vadd.f32 %v1906_v7, %v1897_v46  ;;  %v1910_v20 = vadd.f32 %v1906_v7, %v1898_v0  ;;  %v1913_v61 = vadd.f32 %v1906_v7, %v1901_v8  ;;  %v1914_v59 = vadd.f32 %v1906_v7, %v1902_v12 }
 0x334   : > { %v1919_v45 = vadd.f32 %v1911_v51, %v643_v6  ;;  %v1920_v31 = vadd.f32 %v1912_v24, %v644_v22  ;;  %v1915_v21 = vadd.f32 %v1907_v47, %v639_v50  ;;  %v1916_v2 = vadd.f32 %v1908_v36, %v640_v3 }
 0x335   : > { %v1917_v34 = vadd.f32 %v1909_v23, %v641_v16  ;;  %v1918_v54 = vadd.f32 %v1910_v20, %v642_v35  ;;  %v1921_v62 = vadd.f32 %v1913_v61, %v645_v18  ;;  %v1922_v5 = vadd.f32 %v1914_v59, %v646_v32 }
 0x336   : > { %vm1927_vm8 = vcmp.ge.f32.partialorder %v1919_v45, 0.0  ;;  %vm1928_vm12 = vcmp.ge.f32.partialorder %v1920_v31, 0.0  ;;  %v1935_v30 = vmul.f32 0.01, %v1919_v45  ;;  %v1936_v44 = vmul.f32 0.01, %v1920_v31 }
 0x337   : > { %vm1923_vm13 = vcmp.ge.f32.partialorder %v1915_v21, 0.0  ;;  %vm1924_vm5 = vcmp.ge.f32.partialorder %v1916_v2, 0.0  ;;  %vm1925_vm15 = vcmp.ge.f32.partialorder %v1917_v34, 0.0  ;;  %vm1926_vm14 = vcmp.ge.f32.partialorder %v1918_v54, 0.0 }
 0x338   : > { %v1943_v17 = vsel %vm1927_vm8, %v1919_v45, %v1935_v30  ;;  %v1944_v27 = vsel %vm1928_vm12, %v1920_v31, %v1936_v44  ;;  %vm1929_vm10 = vcmp.ge.f32.partialorder %v1921_v62, 0.0  ;;  %vm1930_vm9 = vcmp.ge.f32.partialorder %v1922_v5, 0.0 }
 0x339   : > { %v2246_v37 = vpack.c.bf16 %v1944_v27, %v1943_v17  ;;  %v1931_v38 = vmul.f32 0.01, %v1915_v21  ;;  %v1932_v33 = vmul.f32 0.01, %v1916_v2  ;;  %v1933_v39 = vmul.f32 0.01, %v1917_v34 }
 0x33a   : > { %v1934_v41 = vmul.f32 0.01, %v1918_v54  ;;  %v1937_v13 = vmul.f32 0.01, %v1921_v62  ;;  %v1938_v56 = vmul.f32 0.01, %v1922_v5 }
 0x33b   : > { %v1939_v26 = vsel %vm1923_vm13, %v1915_v21, %v1931_v38  ;;  %v1940_v42 = vsel %vm1924_vm5, %v1916_v2, %v1932_v33  ;;  %v1941_v60 = vsel %vm1925_vm15, %v1917_v34, %v1933_v39  ;;  %2254 = vst [vmem:[%s257_s23 + $0x10] sm:$0xff] %v2246_v37  }
 0x33c   : > { %v1942_v9 = vsel %vm1926_vm14, %v1918_v54, %v1934_v41  ;;  %v1945_v1 = vsel %vm1929_vm10, %v1921_v62, %v1937_v13  ;;  %v1946_v49 = vsel %vm1930_vm9, %v1922_v5, %v1938_v56  ;;  %v2236_v43 = vpack.c.bf16 %v1940_v42, %v1939_v26 }
 0x33d   : > { %v2241_v52 = vpack.c.bf16 %v1942_v9, %v1941_v60  ;;  %v2251_v10 = vpack.c.bf16 %v1946_v49, %v1945_v1 }
 0x33e   : > { %2237 = vst [vmem:[%s257_s23] sm:$0xff] %v2236_v43  }
 0x33f   : > { %2253 = vst [vmem:[%s257_s23 + $0x8] sm:$0xff] %v2241_v52   ;;  %2255 = vst [vmem:[%s257_s23 + $0x18] sm:$0xff] %v2251_v10  }
 0x340   : > { %2817 = shalt.err (!%p2814_p4)
}
 0x341   : > { %s2818_s5 = scalar_lea.hbm %s3671_s14, 512  ;;  %s2822_s12 = scalar_lea.hbm %s3721_s4, 1024 }
 0x342   : > { %p2819_p9 = scmp.ne.s32.totalorder %s3671_s14, %s2818_s5  ;;  %p2823_p8 = scmp.lt.u32.totalorder %s3671_s14, %s3721_s4 }
 0x343   : > { %p2824_p13 = scmp.lt.u32.totalorder %s2822_s12, %s2818_s5  ;;  %p2826_p10 = scmp.lt.u32.totalorder %s2818_s5, %s3671_s14 }
 0x344   : > { %p2820_p0 = pnand %p2819_p9, %p3062_p5 }
 0x345   : > { %p2825_p6 = por %p2824_p13, %p2823_p8 }
 0x346   : > { %p2821_p11 = pneg %p2820_p0 }
 0x347   : > { %p2827_p3 = por %p2826_p10, %p2825_p6 }
 0x349   : > { %p2828_p7 = pnand %p2827_p3, %p2821_p11 }
 0x34b   : > { %2831 = shalt.err (!%p2828_p7)
}
 0x34c   : > { %s2890_s21 = smov 64   ;;  %s2891_s23 = smov 4  }
 0x34d   : > { %2514 = dma.vmem_to_hbm [thread:$0]  (%p3062_p5), %s3673_s9, 512, %s3671_s14, %s1988_s7, %s2890_s21, %s2890_s21, %s2891_s23  }
 0x34e PF: > { %s2016_s19 = sand.u32 1, %s2866_s15   ;;  %p3789_p12 = scmp.ne.s32.totalorder %s3726_s22, 0 }
 0x34f   : > { %p3790_p2 = scmp.ge.s32.totalorder %s2878_s18, 2  ;;  %s2017_s10 = scalar_lea.sflag [#allocation4], %s2016_s19 }
 0x351   : > { %p2531_p1 = pnand %p3790_p2, %p3789_p12 }
 0x353   : > { %2861 = dma.done.wait (!%p2531_p1), %s2017_s10, 512  }
 0x354   : > { %2863 = vsyncadd (!%p2531_p1), %s2017_s10, 4294966784  ;;  %p19_p4 = scmp.ge.s32.totalorder %s3030_s20, 4   ;;  %s3791_s15 = smov %s2870_s16 }
 0x355   : > { %s3792_s16 = smov %s2874_s17  ;;  %s3793_s17 = smov %s3058_s26 }
 0x356   : > { %s3794_s18 = smov %s3030_s20  ;;  %21 = sbr.rel (!%p19_p4) target bundleno = 7 (0x7), region = 95 }
 0x35d   :  { %2022 = vsyncpa [#allocation3], 1 }
 0x35e   :  { %2024 = vsyncpa [#allocation3 + $0x1], 1 }
 0x35f   :  { %2025 = vsyncpa [#allocation6], 1 }
 0x360   :  { %2026 = vsyncpa [#allocation9], 1 }
 0x361   :  { %2027 = vsyncpa [#allocation4], 1 }
 0x362   :  { %2029 = vsyncpa [#allocation4 + $0x1], 1 }

</bundles_post_ra>
